<compile_context>
chip_gen: v5e
topology: v5e:2x2
jax: 0.10.0
libtpu: 0.0.40
codegen_flags: <defaults>
</compile_context>

<pallas_src>
import math
from functools import partial, lru_cache

import jax
import jax.numpy as jnp
from jax import lax
from jax.experimental import pallas as pl
from jax.experimental.pallas import tpu as pltpu


_MASK_VALUE = -0.7 * float(jnp.finfo(jnp.float32).max)   # finite -> NaN-safe exp/max


# ---------------------------------------------------------------------------
# Helpers
# ---------------------------------------------------------------------------
def _pick_tile(dim, candidates):
    """Largest candidate tile that divides `dim`; fall back to the full dim."""
    for c in candidates:
        if c <= dim and dim % c == 0:
            return c
    # TODO(synk): pad + mask the remainder instead of a single full-dim block for large,
    # non-divisible dims (full-dim fallback can exceed VMEM and kills pipelining).
    return dim


@lru_cache(maxsize=None)
def _vmem_limit_bytes():
    """Generation-aware scoped-VMEM limit (v7x has 64 MiB physical, v5e/v6e 128 MiB)."""
    try:
        cap = int(pltpu.get_tpu_info().vmem_capacity_bytes)
    except Exception:
        cap = 64 * 1024 * 1024
    return int(min(max(cap // 2, 16 * 1024 * 1024), 64 * 1024 * 1024))


# ---------------------------------------------------------------------------
# Tiled matmul (linear projections), bf16 MXU operands + f32 VMEM accumulator
# ---------------------------------------------------------------------------
def _matmul_kernel(x_ref, w_ref, o_ref, acc_ref):
    @pl.when(pl.program_id(2) == 0)
    def _init():
        acc_ref[...] = jnp.zeros_like(acc_ref)

    acc_ref[...] += jnp.dot(x_ref[...], w_ref[...],
                            preferred_element_type=jnp.float32)

    @pl.when(pl.program_id(2) == pl.num_programs(2) - 1)
    def _store():
        o_ref[...] = acc_ref[...].astype(o_ref.dtype)


def pallas_linear(x2d, w, out_dtype=None):
    """(M, K) @ (K, N) -> (M, N); K on the grid ('arbitrary'), M/N 'parallel'."""
    M, K = x2d.shape
    K2, N = w.shape
    assert K == K2
    out_dtype = out_dtype or x2d.dtype
    tm = _pick_tile(M, (512, 256, 128, 64, 32, 16, 8))
    tn = _pick_tile(N, (512, 256, 128))
    tk = _pick_tile(K, (512, 256, 128))
    grid = (M // tm, N // tn, K // tk)
    return pl.pallas_call(
        _matmul_kernel,
        out_shape=jax.ShapeDtypeStruct((M, N), out_dtype),
        grid=grid,
        in_specs=[
            pl.BlockSpec((tm, tk), lambda i, j, k: (i, k)),
            pl.BlockSpec((tk, tn), lambda i, j, k: (k, j)),
        ],
        out_specs=pl.BlockSpec((tm, tn), lambda i, j, k: (i, j)),
        scratch_shapes=[pltpu.VMEM((tm, tn), jnp.float32)],
        compiler_params=pltpu.CompilerParams(
            dimension_semantics=("parallel", "parallel", "arbitrary"),
            vmem_limit_bytes=_vmem_limit_bytes()),
        cost_estimate=pl.CostEstimate(
            flops=2 * M * N * K,
            transcendentals=0,
            bytes_accessed=(M * K + K * N) * x2d.dtype.itemsize
                           + M * N * jnp.dtype(out_dtype).itemsize),
    )(x2d, w)


# ---------------------------------------------------------------------------
# Flash-style causal GQA, consuming the fused qkv buffer directly.
#   qkv: (B*T, d_out + 2*kv_dim)   rope tables: (T, hd)   ->   ctx: (B*T, d_out)
# ---------------------------------------------------------------------------
def _gqa_flash_kernel(q_ref, k_ref, v_ref, cq_ref, sq_ref, ck_ref, sk_ref,
                      o_ref, q_sc, m_sc, l_sc, acc_sc, *, tq, tk, gs, hd):
    qi = pl.program_id(2)
    ki = pl.program_id(3)
    q_start = qi * tq
    k_start = ki * tk
    h2 = hd // 2

    @pl.when(ki == 0)
    def _init():
        # RoPE (rotate-half form; weights were de-interleaved at init) on Q, once per
        # Q tile.  Cached head-major in q_sc: row h*tq + t  <->  (head h, token t).
        cos = cq_ref[...]
        sin = sq_ref[...]
        for h in range(gs):                                   # once per Q tile, not per KV tile
            qh = q_ref[:, h * hd:(h + 1) * hd]                # (tq, hd), 128-aligned slice
            rot = jnp.concatenate([-qh[:, h2:], qh[:, :h2]], axis=-1)
            q_sc[h * tq:(h + 1) * tq, :] = (qh * cos + rot * sin).astype(q_sc.dtype)
        m_sc[...] = jnp.full_like(m_sc, -jnp.inf)
        l_sc[...] = jnp.zeros_like(l_sc)
        acc_sc[...] = jnp.zeros_like(acc_sc)

    # Skip KV tiles entirely in the causal future of this Q tile.
    @pl.when(k_start <= q_start + (tq - 1))
    def _compute():
        # RoPE on K (this KV tile), kept in the MXU dtype.
        k = k_ref[...]
        k_rot = jnp.concatenate([-k[:, h2:], k[:, :h2]], axis=-1)
        kr = (k * ck_ref[...] + k_rot * sk_ref[...]).astype(k_ref.dtype)
        v = v_ref[...]

        # ONE matmul for all query heads of this KV group: (gs*tq, hd) x (hd, tk).
        s = lax.dot_general(q_sc[...], kr, (((1,), (1,)), ((), ())),
                            preferred_element_type=jnp.float32)

        def _update(scores):
            m_prev = m_sc[...]
            m_new = jnp.maximum(m_prev, jnp.max(scores, axis=-1, keepdims=True))
            alpha = jnp.exp(m_prev - m_new)
            p = jnp.exp(scores - m_new)
            l_sc[...] = alpha * l_sc[...] + jnp.sum(p, axis=-1, keepdims=True)
            acc_sc[...] = alpha * acc_sc[...] + lax.dot_general(
                p.astype(v.dtype), v, (((1,), (0,)), ((), ())),
                preferred_element_type=jnp.float32)
            m_sc[...] = m_new

        is_interior = k_start + (tk - 1) <= q_start           # fully unmasked KV tile

        @pl.when(is_interior)
        def _fast():
            _update(s)

        @pl.when(jnp.logical_not(is_interior))
        def _masked():
            # Only diagonal-straddling tiles pay for the iotas / compare / select.
            r_tok = q_start + lax.broadcasted_iota(jnp.int32, (tq, tk), 0)
            c_tok = k_start + lax.broadcasted_iota(jnp.int32, (tq, tk), 1)
            future = jnp.tile(c_tok > r_tok, (gs, 1))          # same mask for every head
            _update(jnp.where(future, _MASK_VALUE, s))

    @pl.when(ki == pl.num_programs(3) - 1)
    def _finalize():
        out_all = acc_sc[...] / l_sc[...]                      # exact divide, once per Q tile
        for h in range(gs):
            o_ref[:, h * hd:(h + 1) * hd] = (
                out_all[h * tq:(h + 1) * tq, :].astype(o_ref.dtype))


def pallas_gqa_attention(qkv, rope_cos, rope_sin, *, batch, seq, num_heads,
                         num_kv_groups, head_dim, block_q=None, block_kv=None):
    B, T = batch, seq
    G, hd = num_kv_groups, head_dim
    gs = num_heads // G
    d_out = num_heads * hd
    rows, cols = qkv.shape
    assert rows == B * T and cols == d_out + 2 * G * hd
    assert hd % 128 == 0, "fused-qkv column BlockSpecs need head_dim % 128 == 0 (lane tiling)"

    tq = block_q if block_q is not None else _pick_tile(T, (256, 128, 64, 32, 16, 8))
    tk = block_kv if block_kv is not None else _pick_tile(T, (256, 128, 64, 32, 16, 8))
    assert T % tq == 0 and T % tk == 0 and tq % tk == 0
    assert tq % 8 == 0 and tk % 8 == 0
    nq, nk = T // tq, T // tk
    span = tq // tk                                  # KV tiles spanned by one Q tile

    # Clamp ki to the causal frontier so compute-skipped future tiles re-reference the
    # resident K/V block instead of issuing fresh DMAs (~2x less K/V HBM traffic).
    def kv_block(qi, ki):
        return jnp.minimum(ki, qi * span + (span - 1))

    q_spec = pl.BlockSpec((tq, gs * hd), lambda b, g, qi, ki: (b * nq + qi, g))
    k_spec = pl.BlockSpec((tk, hd),
                          lambda b, g, qi, ki: (b * nk + kv_block(qi, ki), num_heads + g))
    v_spec = pl.BlockSpec((tk, hd),
                          lambda b, g, qi, ki: (b * nk + kv_block(qi, ki), num_heads + G + g))
    cq_spec = pl.BlockSpec((tq, hd), lambda b, g, qi, ki: (qi, 0))
    sq_spec = pl.BlockSpec((tq, hd), lambda b, g, qi, ki: (qi, 0))
    ck_spec = pl.BlockSpec((tk, hd), lambda b, g, qi, ki: (kv_block(qi, ki), 0))
    sk_spec = pl.BlockSpec((tk, hd), lambda b, g, qi, ki: (kv_block(qi, ki), 0))
    o_spec = pl.BlockSpec((tq, gs * hd), lambda b, g, qi, ki: (b * nq + qi, g))

    kernel = partial(_gqa_flash_kernel, tq=tq, tk=tk, gs=gs, hd=hd)
    grid = (B, G, nq, nk)
    # TODO(synk): sweep pipeline_mode=pl.Buffered(3) on the K/V specs (deeper KV prefetch).
    return pl.pallas_call(
        kernel,
        out_shape=jax.ShapeDtypeStruct((B * T, d_out), qkv.dtype),
        grid=grid,
        in_specs=[q_spec, k_spec, v_spec, cq_spec, sq_spec, ck_spec, sk_spec],
        out_specs=o_spec,
        scratch_shapes=[
            pltpu.VMEM((gs * tq, hd), qkv.dtype),    # roped Q, cached across KV tiles
            pltpu.VMEM((gs * tq, 1), jnp.float32),   # running max  m
            pltpu.VMEM((gs * tq, 1), jnp.float32),   # running sum  l
            pltpu.VMEM((gs * tq, hd), jnp.float32),  # output accumulator
        ],
        compiler_params=pltpu.CompilerParams(
            dimension_semantics=("parallel", "parallel", "parallel", "arbitrary"),
            vmem_limit_bytes=_vmem_limit_bytes()),
        cost_estimate=pl.CostEstimate(                 # ~causal-halved QK^T + PV
            flops=2 * B * num_heads * T * T * hd,
            transcendentals=B * num_heads * T * T // 2,
            bytes_accessed=(qkv.size + B * T * d_out) * qkv.dtype.itemsize),
    )(qkv, qkv, qkv, rope_cos, rope_sin, rope_cos, rope_sin)


# ---------------------------------------------------------------------------
# RoPE tables (Llama interleaved-pair rotation)
# ---------------------------------------------------------------------------
def precompute_rope(context_length, head_dim, base=10000.0):
    inv_freq = 1.0 / (base ** (jnp.arange(0, head_dim, 2, dtype=jnp.float32) / head_dim))
    t = jnp.arange(context_length, dtype=jnp.float32)
    angles = jnp.outer(t, inv_freq)          # (ctx, head_dim // 2)
    return jnp.cos(angles), jnp.sin(angles)


def apply_rope_interleaved(x, cos, sin):
    """Reference (torch-equivalent) interleaved-pair RoPE.  x: (..., head_dim)."""
    x1 = x[..., 0::2]
    x2 = x[..., 1::2]
    r1 = x1 * cos - x2 * sin
    r2 = x1 * sin + x2 * cos
    return jnp.stack([r1, r2], axis=-1).reshape(x.shape)


# ---------------------------------------------------------------------------
# Module
# ---------------------------------------------------------------------------
class GroupedQueryAttentionPallas:
    def __init__(self, d_in, d_out, context_length, num_heads, num_kv_groups,
                 rope_base=10000.0, key=None, compute_dtype=jnp.bfloat16,
                 attn_block_q=None, attn_block_kv=None):
        assert d_out % num_heads == 0
        assert num_heads % num_kv_groups == 0
        self.d_in = d_in
        self.d_out = d_out
        self.num_heads = num_heads
        self.num_kv_groups = num_kv_groups
        self.head_dim = d_out // num_heads
        self.group_size = num_heads // num_kv_groups
        self.kv_dim = num_kv_groups * self.head_dim
        self.context_length = context_length
        self.compute_dtype = compute_dtype
        self.attn_block_q = attn_block_q
        self.attn_block_kv = attn_block_kv

        hd = self.head_dim
        k1, k2, k3, k4 = jax.random.split(key, 4)
        s_in = 1.0 / math.sqrt(d_in)
        s_out = 1.0 / math.sqrt(d_out)
        # torch.nn.Linear-style init; logical weights stored (in, out) in compute dtype.
        self.W_query = jax.random.uniform(k1, (d_in, d_out), jnp.float32, -s_in, s_in).astype(compute_dtype)
        self.W_key = jax.random.uniform(k2, (d_in, self.kv_dim), jnp.float32, -s_in, s_in).astype(compute_dtype)
        self.W_value = jax.random.uniform(k3, (d_in, self.kv_dim), jnp.float32, -s_in, s_in).astype(compute_dtype)
        self.W_out = jax.random.uniform(k4, (d_out, d_out), jnp.float32, -s_out, s_out).astype(compute_dtype)

        # Fused QKV weight for the kernels.
        #  * Q/K columns are de-interleaved per head (even dims first, odd dims second) so
        #    the interleaved-pair RoPE becomes rotate-half inside the attention kernel
        #    (q.k dot products are invariant under the shared per-head permutation).
        #  * The softmax scale 1/sqrt(head_dim) is folded into the Q columns once.
        perm = jnp.concatenate([jnp.arange(0, hd, 2), jnp.arange(1, hd, 2)])

        def _deinterleave(w, n_heads):
            w3 = w.astype(jnp.float32).reshape(d_in, n_heads, hd)
            return w3[:, :, perm].reshape(d_in, n_heads * hd)

        wq = _deinterleave(self.W_query, num_heads) * (1.0 / math.sqrt(hd))
        wk = _deinterleave(self.W_key, num_kv_groups)
        wv = self.W_value.astype(jnp.float32)
        self.W_qkv = jnp.concatenate([wq, wk, wv], axis=1).astype(compute_dtype)

        # ref_* : interleaved tables for the pure-JAX reference;
        # rope_*: rotate-half tables consumed by the attention kernel (cos/sin tiled x2).
        cos, sin = precompute_rope(context_length, hd, rope_base)      # (ctx, hd//2)
        self.ref_cos, self.ref_sin = cos, sin
        self.rope_cos = jnp.concatenate([cos, cos], axis=-1)           # (ctx, hd) f32
        self.rope_sin = jnp.concatenate([sin, sin], axis=-1)

    def __call__(self, x):
        B, T, d_in = x.shape
        assert d_in == self.d_in and T <= self.context_length
        x2d = x.reshape(B * T, d_in).astype(self.compute_dtype)

        # Fused Q/K/V projection: one tiled MXU matmul, x read from HBM once.
        qkv = pallas_linear(x2d, self.W_qkv)                           # (B*T, d_out + 2*kv)

        # Flash-style causal GQA consuming qkv directly; RoPE + scale are fused in-kernel.
        ctx = pallas_gqa_attention(
            qkv, self.rope_cos[:T], self.rope_sin[:T],
            batch=B, seq=T, num_heads=self.num_heads,
            num_kv_groups=self.num_kv_groups, head_dim=self.head_dim,
            block_q=self.attn_block_q, block_kv=self.attn_block_kv)    # (B*T, d_out)

        out = pallas_linear(ctx, self.W_out, out_dtype=x.dtype)
        return out.reshape(B, T, self.d_out)


# Pure-JAX reference (mirrors the PyTorch forward, incl. repeat_interleave on KV),
# run in f32 from the same stored (bf16) weights.
def reference_forward(mod, x):
    B, T, _ = x.shape
    xf = x.astype(mod.compute_dtype).astype(jnp.float32)
    wq = mod.W_query.astype(jnp.float32)
    wk = mod.W_key.astype(jnp.float32)
    wv = mod.W_value.astype(jnp.float32)
    wo = mod.W_out.astype(jnp.float32)
    q = (xf @ wq).reshape(B, T, mod.num_heads, mod.head_dim).transpose(0, 2, 1, 3)
    k = (xf @ wk).reshape(B, T, mod.num_kv_groups, mod.head_dim).transpose(0, 2, 1, 3)
    v = (xf @ wv).reshape(B, T, mod.num_kv_groups, mod.head_dim).transpose(0, 2, 1, 3)
    cos, sin = mod.ref_cos[:T], mod.ref_sin[:T]
    q = apply_rope_interleaved(q, cos, sin)
    k = apply_rope_interleaved(k, cos, sin)
    k = jnp.repeat(k, mod.group_size, axis=1)
    v = jnp.repeat(v, mod.group_size, axis=1)
    s = jnp.einsum("bhqd,bhkd->bhqk", q, k) / math.sqrt(mod.head_dim)
    mask = jnp.triu(jnp.ones((T, T), bool), 1)
    s = jnp.where(mask, -jnp.inf, s)
    w = jax.nn.softmax(s, axis=-1)
    ctx = jnp.einsum("bhqk,bhkd->bhqd", w, v).transpose(0, 2, 1, 3).reshape(B, T, mod.d_out)
    return ctx @ wo


if __name__ == "__main__":
    key = jax.random.PRNGKey(0)
    k_param, k_x = jax.random.split(key)

    # Small but layout-friendly Llama-like config: head_dim=128 keeps the fused-qkv column
    # BlockSpecs lane-aligned; T=256 with 128-token tiles exercises the multi-tile online
    # softmax, the boundary-tile mask path and the causal compute/DMA skip path.
    B, T = 2, 256
    d_in, d_out = 256, 512
    num_heads, num_kv_groups = 4, 2
    context_length = 256

    gqa = GroupedQueryAttentionPallas(
        d_in, d_out, context_length, num_heads, num_kv_groups, key=k_param,
        attn_block_q=128, attn_block_kv=128)
    x = jax.random.normal(k_x, (B, T, d_in), dtype=jnp.float32)

    out = jax.block_until_ready(gqa(x))
    ref = reference_forward(gqa, x)

    assert out.shape == (B, T, d_out)
    assert not bool(jnp.any(jnp.isnan(out)))
    # bf16 MXU operands (f32 accumulation) vs. the f32 reference built from the same
    # bf16-stored weights -> a few 1e-3 of absolute error.
    assert jnp.allclose(out, ref, atol=2e-2, rtol=2e-2), "mismatch vs pure-JAX reference"

    print("KERNEL_OK")
</pallas_src>

<mosaic_0001>
module attributes {stable_mosaic.version = 11 : i64} {
  func.func @_matmul_kernel(%arg0: i32, %arg1: i32, %arg2: i32, %arg3: memref<512x256xbf16, #tpu.memory_space<vmem>>, %arg4: memref<256x512xbf16, #tpu.memory_space<vmem>>, %arg5: memref<512x512xbf16, #tpu.memory_space<vmem>>, %arg6: memref<512x512xf32, #tpu.memory_space<vmem>>) attributes {dimension_semantics = [#tpu.dimension_semantics<parallel>, #tpu.dimension_semantics<parallel>, #tpu.dimension_semantics<arbitrary>], iteration_bounds = array<i64: 1, 2, 1>, scalar_prefetch = 0 : i64, scratch_operands = 1 : i64, tpu.core_type = #tpu.core_type<tc>, window_params = [{transform_indices = @transform_0, window_bounds = array<i64: 512, 256>}, {transform_indices = @transform_1, window_bounds = array<i64: 256, 512>}, {transform_indices = @transform_2, window_bounds = array<i64: 512, 512>}]} {
    %c0_i32 = arith.constant 0 : i32
    %0 = arith.cmpi eq, %arg2, %c0_i32 : i32
    %1 = arith.extui %0 : i1 to i32
    %c0_i32_0 = arith.constant 0 : i32
    %2 = arith.cmpi ne, %1, %c0_i32_0 : i32
    scf.if %2 {
      %cst_10 = arith.constant 0.000000e+00 : f32
      %12 = vector.broadcast %cst_10 : f32 to vector<512x512xf32>
      %c0_11 = arith.constant 0 : index
      %c0_12 = arith.constant 0 : index
      %13 = vector.load %arg6[%c0_11, %c0_12] : memref<512x512xf32, #tpu.memory_space<vmem>>, vector<512x512xf32>
      tpu.vector_store %arg6[%c0_11, %c0_12], %12 {strides = array<i32>} : memref<512x512xf32, #tpu.memory_space<vmem>>, vector<512x512xf32>,
    } else {
    }
    %c0 = arith.constant 0 : index
    %c0_1 = arith.constant 0 : index
    %3 = vector.load %arg6[%c0, %c0_1] : memref<512x512xf32, #tpu.memory_space<vmem>>, vector<512x512xf32>
    %c0_2 = arith.constant 0 : index
    %c0_3 = arith.constant 0 : index
    %4 = vector.load %arg3[%c0_2, %c0_3] : memref<512x256xbf16, #tpu.memory_space<vmem>>, vector<512x256xbf16>
    %c0_4 = arith.constant 0 : index
    %c0_5 = arith.constant 0 : index
    %5 = vector.load %arg4[%c0_4, %c0_5] : memref<256x512xbf16, #tpu.memory_space<vmem>>, vector<256x512xbf16>
    %cst = arith.constant dense<0.000000e+00> : vector<512x512xf32>
    %6 = tpu.matmul %4, %5, %cst {dimension_numbers = #tpu.dot_dimension_numbers<[1], [0], [0], [1], [0, 0, 1, 1], [], []>} : vector<512x256xbf16>, vector<256x512xbf16>, vector<512x512xf32> -> vector<512x512xf32>
    %7 = arith.addf %3, %6 : vector<512x512xf32>
    %c0_6 = arith.constant 0 : index
    %c0_7 = arith.constant 0 : index
    %8 = vector.load %arg6[%c0_6, %c0_7] : memref<512x512xf32, #tpu.memory_space<vmem>>, vector<512x512xf32>
    tpu.vector_store %arg6[%c0_6, %c0_7], %7 {strides = array<i32>} : memref<512x512xf32, #tpu.memory_space<vmem>>, vector<512x512xf32>,
    %c0_i32_8 = arith.constant 0 : i32
    %9 = arith.cmpi eq, %arg2, %c0_i32_8 : i32
    %10 = arith.extui %9 : i1 to i32
    %c0_i32_9 = arith.constant 0 : i32
    %11 = arith.cmpi ne, %10, %c0_i32_9 : i32
    scf.if %11 {
      %c0_10 = arith.constant 0 : index
      %c0_11 = arith.constant 0 : index
      %12 = vector.load %arg6[%c0_10, %c0_11] : memref<512x512xf32, #tpu.memory_space<vmem>>, vector<512x512xf32>
      %13 = arith.truncf %12 : vector<512x512xf32> to vector<512x512xbf16>
      %c0_12 = arith.constant 0 : index
      %c0_13 = arith.constant 0 : index
      %14 = vector.load %arg5[%c0_12, %c0_13] : memref<512x512xbf16, #tpu.memory_space<vmem>>, vector<512x512xbf16>
      tpu.vector_store %arg5[%c0_12, %c0_13], %13 {strides = array<i32>} : memref<512x512xbf16, #tpu.memory_space<vmem>>, vector<512x512xbf16>,
    } else {
    }
    return
  }
  func.func @transform_0(%arg0: i32, %arg1: i32, %arg2: i32) -> (i32, i32) {
    %c0_i32 = arith.constant 0 : i32
    return %arg0, %arg2 : i32, i32
  }
  func.func @transform_1(%arg0: i32, %arg1: i32, %arg2: i32) -> (i32, i32) {
    %c0_i32 = arith.constant 0 : i32
    return %arg2, %arg1 : i32, i32
  }
  func.func @transform_2(%arg0: i32, %arg1: i32, %arg2: i32) -> (i32, i32) {
    %c0_i32 = arith.constant 0 : i32
    return %arg0, %arg1 : i32, i32
  }
}

</mosaic_0001>

<bundles_post_ra>
// kernel: tpu_custom_call.1
= control target key start
LH: loop header
LB: loop body
LE: loop exit
PB: predicated region body
PF: predicated region fallthrough
CT: control target
= control target key end

     0   :  { %7 = vsyncpa [#allocation4], 0  ;;  %s5722_s0 = inlined_call_operand.hbm [shape: bf16[512,256], index: 0, kind: input, shape index: {}]   ;;  %s5723_s1 = inlined_call_operand.hbm [shape: bf16[256,1024], index: 1, kind: input, shape index: {}]   ;;  %s5724_s2 = inlined_call_operand.hbm [shape: bf16[512,1024], index: 2, kind: output, shape index: {}]  }
   0x1   :  { %8 = vsyncpa [#allocation7], 0 }
   0x2   :  { %10 = vsyncpa [#allocation7 + $0x1], 0 }
   0x3   :  { %11 = vsyncpa [#allocation5], 0 }
   0x4   :  { %13 = vsyncpa [#allocation5 + $0x1], 0  ;;  %s4927_s9 = smov 0   ;;  %s4929_s10 = smov 0  }
   0x5   :  { %s4931_s11 = smov 0   ;;  %s4933_s12 = smov 0  }
   0x6   :  { %s4935_s13 = smov 0   ;;  %s4937_s14 = smov 0  }
   0x7 LB: > { %s4015_s15 = sadd.s32 4294967295, %s4901_s14   ;;  %s4016_s16 = sadd.s32 4294967294, %s4901_s14   ;;  %s4901_s14 = sphi %s4937_s14, %s19_s14   ;;  %s4897_s13 = sphi %s4935_s13, %s5804_s13   ;;  %s4893_s12 = sphi %s4933_s12, %s5803_s12   ;;  %s4889_s11 = sphi %s4931_s11, %s5802_s11   ;;  %s4885_s10 = sphi %s4929_s10, %s5801_s10   ;;  %s4881_s9 = sphi %s4927_s9, %s5800_s9  }
   0x8   : > { %p88_p0 = scmp.ne.s32.totalorder %s4885_s10, %s4881_s9  ;;  %p4961_p1 = scmp.eq.s32.totalorder %s4015_s15, 0 }
   0x9   : > { %p4965_p2 = scmp.eq.s32.totalorder %s4015_s15, 1  ;;  %p120_p3 = scmp.eq.s32.totalorder %s4016_s16, 1 }
   0xa   : > { %p4971_p4 = por %p4961_p1, %p88_p0  ;;  %p4017_p5 = scmp.ge.s32.totalorder %s4901_s14, 1 }
   0xb   : > { %p4976_p6 = por %p120_p3, %p88_p0  ;;  %p127_p7 = scmp.lt.s32.totalorder %s4901_s14, 3 }
   0xc   : > { %s144_s23 = sshll.u32 %s5722_s0, 4  ;;  %s4903_s25 = smov [#allocation3]   ;;  %s145_s23 = int_to_ptr.hbm [resolvable:$true] %s144_s23 }
   0xd   : > { %p4984_p8 = pnand %p4017_p5, %p127_p7  ;;  %s146_s26 = sshll.u32 %s4903_s25, 4  ;;  %s147_s26 = int_to_ptr.vmem [resolvable:$true] %s146_s26 }
   0xe   : > { %p4019_p11 = scmp.ge.s32.totalorder %s4901_s14, 2  ;;  %s4904_s27 = smov 128  }
   0xf   : > { %p4682_p9 = pneg %p4984_p8  ;;  %s4905_s28 = smov 8  }
  0x10   : > { %s34_s29 = sadd.s32 1, %s4897_s13  ;;  %s75_s30 = sadd.s32 1, %s4889_s11 }
  0x11   : > { %p4683_p10 = pnand %p4682_p9, %p4961_p1  ;;  %p36_p12 = scmp.ge.s32.totalorder %s34_s29, 2 }
  0x12   : > { %p82_p13 = scmp.ne.s32.totalorder %s4889_s11, %s4885_s10  ;;  %p83_p0 = scmp.eq.s32.totalorder %s4901_s14, 0 }
  0x13   : > { %4685 = dma.hbm_to_vmem [thread:$0]  (!%p4683_p10), %s145_s23, 8192, %s147_s26, [#allocation4], %s4904_s27, %s4904_s27, %s4905_s28  }
  0x14   : > { %s5806_s29 = smov (%p36_p12, %s34_s29), 0  ;;  %p5000_p3 = por %p83_p0, %p82_p13 }
  0x15   : > { %p5006_p5 = por %p4965_p2, %p82_p13  ;;  %s71_s5 = ssub.s32 %s4897_s13, %s5806_s29 }
  0x16   : > { %p4695_p7 = scmp.lt.s32.totalorder %s4901_s14, 2  ;;  %p73_p9 = scmp.eq.s32.totalorder %s71_s5, 0 }
  0x17   : > { %s160_s6 = sand.u32 1, %s4889_s11   ;;  %s4544_s15 = sshll.u32 %s4897_s13, 4 }
  0x18   : > { %s4020_s7 = sshll.u32 %s160_s6, 9  ;;  %s172_s22 = scalar_lea.hbm %s5723_s1, %s4544_s15 }
  0x19   : > { %s5015_s8 = scalar_select %p73_p9, %s4889_s11, %s75_s30  }
  0x1a   : > { %s164_s23 = scalar_lea.vmem [#allocation6], %s4020_s7  ;;  %s173_s18 = sshll.u32 %s172_s22, 4  ;;  %s174_s18 = int_to_ptr.hbm [resolvable:$true] %s173_s18 }
  0x1b   : > { %s175_s25 = sshll.u32 %s164_s23, 4  ;;  %p4687_p2 = pnand %p4695_p7, %p5000_p3  ;;  %s176_s25 = int_to_ptr.vmem [resolvable:$true] %s175_s25 }
  0x1c   : > { %s161_s26 = scalar_lea.sflag [#allocation7], %s160_s6  ;;  %s4906_s27 = smov 512  }
  0x1d   : > { %s4907_s28 = smov 256   ;;  %s4908_s5 = smov 16  }
  0x1e   : > { %4689 = dma.hbm_to_vmem [thread:$0]  (!%p4687_p2), %s174_s18, 8192, %s176_s25, %s161_s26, %s4906_s27, %s4907_s28, %s4908_s5  }
  0x1f   : > { %187 = sbr.rel (%p4984_p8) target bundleno = 1235 (0x4d3), region = 28 }
  0x24   : > { %4868 = dma.done.wait (%p4961_p1), [#allocation4], 8192  }
  0x25   : > { %4870 = vsyncadd (%p4961_p1), [#allocation4], 4294959104  ;;  %s5030_s30 = sand.u32 1, %s4885_s10  }
  0x26   : > { %s4025_s3 = sshll.u32 %s5030_s30, 9  ;;  %s195_s6 = scalar_lea.sflag [#allocation7], %s5030_s30 }
  0x27   : > { %s5034_s7 = scalar_lea.vmem [#allocation6], %s4025_s3 }
  0x28   : > { %4872 = dma.done.wait (%p4971_p4), %s195_s6, 8192  }
  0x29   : > { %4874 = vsyncadd (%p4971_p4), %s195_s6, 4294959104  ;;  %v4397_v0 = vld [vmem:[%s5034_s7 + $0xe0] sm:$0xf]  ;;  %v4639_v1 = vld [vmem:[%s5034_s7 + $0xec] sm:$0xf0]  ;;  %s4026_s17 = sshll.u32 %s5030_s30, 10 }
  0x2a   : > { %v4525_v2 = vld [vmem:[%s5034_s7 + $0x1e0] sm:$0xf]  ;;  %v4398_v3 = vor.u32 %v4639_v1, %v4397_v0  ;;  %v4671_v4 = vld [vmem:[%s5034_s7 + $0x1ec] sm:$0xf0]  ;;  %v4637_v5 = vld [vmem:[%s5034_s7 + $0xe4] sm:$0xf] }
  0x2b   : > { %v4399_v6 = vld [vmem:[%s5034_s7 + $0xf0] sm:$0xf0]  ;;  %v4526_v7 = vor.u32 %v4671_v4, %v4525_v2  ;;  %v4669_v9 = vld [vmem:[%s5034_s7 + $0x1e4] sm:$0xf]  ;;  %v4381_v11 = vld [vmem:[%s5034_s7 + $0xc0] sm:$0xf] }
  0x2c   : > { %v4402_v8 = vor.u32 %v4637_v5, %v4399_v6  ;;  %v4527_v10 = vld [vmem:[%s5034_s7 + $0x1f0] sm:$0xf0]  ;;  %1510 = vmatpush.bf16.msra.mxu0 %v4398_v3  ;;  %v4635_v13 = vld [vmem:[%s5034_s7 + $0xcc] sm:$0xf0]  ;;  %v4509_v14 = vld [vmem:[%s5034_s7 + $0x1c0] sm:$0xf] }
  0x2d   : > { %v4530_v12 = vor.u32 %v4669_v9, %v4527_v10  ;;  %v4667_v15 = vld [vmem:[%s5034_s7 + $0x1cc] sm:$0xf0]  ;;  %1679 = vmatpush.bf16.msra.mxu1 %v4526_v7  ;;  %v4382_v16 = vor.u32 %v4635_v13, %v4381_v11  ;;  %v4633_v18 = vld [vmem:[%s5034_s7 + $0xc4] sm:$0xf]  ;;  %v4383_v19 = vld [vmem:[%s5034_s7 + $0xd0] sm:$0xf0] }
  0x2e   : > { %1848 = vmatpush.bf16.msra.mxu2 %v4402_v8  ;;  %v4510_v17 = vor.u32 %v4667_v15, %v4509_v14  ;;  %v4665_v20 = vld [vmem:[%s5034_s7 + $0x1c4] sm:$0xf]  ;;  %v4386_v21 = vor.u32 %v4633_v18, %v4383_v19  ;;  %v4511_v22 = vld [vmem:[%s5034_s7 + $0x1d0] sm:$0xf0]  ;;  %v4365_v23 = vld [vmem:[%s5034_s7 + $0xa0] sm:$0xf] }
  0x2f   : > { %2017 = vmatpush.bf16.msra.mxu3 %v4530_v12  ;;  %v4631_v24 = vld [vmem:[%s5034_s7 + $0xac] sm:$0xf0]  ;;  %v4514_v25 = vor.u32 %v4665_v20, %v4511_v22  ;;  %v4493_v26 = vld [vmem:[%s5034_s7 + $0x1a0] sm:$0xf]  ;;  %v4629_v28 = vld [vmem:[%s5034_s7 + $0xa4] sm:$0xf] }
  0x30   : > { %v4663_v27 = vld [vmem:[%s5034_s7 + $0x1ac] sm:$0xf0]  ;;  %1511 = vmatpush.bf16.msra.mxu0 %v4382_v16  ;;  %v4366_v29 = vor.u32 %v4631_v24, %v4365_v23  ;;  %v4367_v30 = vld [vmem:[%s5034_s7 + $0xb0] sm:$0xf0]  ;;  %v4661_v31 = vld [vmem:[%s5034_s7 + $0x1a4] sm:$0xf] }
  0x31   : > { %v4495_v32 = vld [vmem:[%s5034_s7 + $0x1b0] sm:$0xf0]  ;;  %1680 = vmatpush.bf16.msra.mxu1 %v4510_v17  ;;  %v4494_v33 = vor.u32 %v4663_v27, %v4493_v26  ;;  %v4370_v34 = vor.u32 %v4629_v28, %v4367_v30  ;;  %v4349_v35 = vld [vmem:[%s5034_s7 + $0x80] sm:$0xf]  ;;  %v4627_v36 = vld [vmem:[%s5034_s7 + $0x8c] sm:$0xf0] }
  0x32   : > { %1849 = vmatpush.bf16.msra.mxu2 %v4386_v21  ;;  %v4477_v37 = vld [vmem:[%s5034_s7 + $0x180] sm:$0xf]  ;;  %v4498_v38 = vor.u32 %v4661_v31, %v4495_v32  ;;  %v4659_v39 = vld [vmem:[%s5034_s7 + $0x18c] sm:$0xf0]  ;;  %v4625_v40 = vld [vmem:[%s5034_s7 + $0x84] sm:$0xf]  ;;  %v4350_v44 = vor.u32 %v4627_v36, %v4349_v35 }
  0x33   : > { %2018 = vmatpush.bf16.msra.mxu3 %v4514_v25  ;;  %v4351_v41 = vld [vmem:[%s5034_s7 + $0x90] sm:$0xf0]  ;;  %v4657_v42 = vld [vmem:[%s5034_s7 + $0x184] sm:$0xf]  ;;  %v4478_v45 = vor.u32 %v4659_v39, %v4477_v37  ;;  %v4333_v47 = vld [vmem:[%s5034_s7 + $0x60] sm:$0xf] }
  0x34   : > { %v4479_v43 = vld [vmem:[%s5034_s7 + $0x190] sm:$0xf0]  ;;  %1512 = vmatpush.bf16.msra.mxu0 %v4366_v29  ;;  %v4354_v46 = vor.u32 %v4625_v40, %v4351_v41  ;;  %v4623_v48 = vld [vmem:[%s5034_s7 + $0x6c] sm:$0xf0]  ;;  %v4461_v49 = vld [vmem:[%s5034_s7 + $0x160] sm:$0xf] }
  0x35   : > { %1681 = vmatpush.bf16.msra.mxu1 %v4494_v33  ;;  %v4482_v50 = vor.u32 %v4657_v42, %v4479_v43  ;;  %v4655_v51 = vld [vmem:[%s5034_s7 + $0x16c] sm:$0xf0]  ;;  %v4621_v52 = vld [vmem:[%s5034_s7 + $0x64] sm:$0xf]  ;;  %v4335_v53 = vld [vmem:[%s5034_s7 + $0x70] sm:$0xf0]  ;;  %v4334_v56 = vor.u32 %v4623_v48, %v4333_v47 }
  0x36   : > { %1850 = vmatpush.bf16.msra.mxu2 %v4370_v34  ;;  %v4653_v54 = vld [vmem:[%s5034_s7 + $0x164] sm:$0xf]  ;;  %v4463_v55 = vld [vmem:[%s5034_s7 + $0x170] sm:$0xf0]  ;;  %v4462_v57 = vor.u32 %v4655_v51, %v4461_v49  ;;  %v4338_v58 = vor.u32 %v4621_v52, %v4335_v53  ;;  %v4317_v59 = vld [vmem:[%s5034_s7 + $0x40] sm:$0xf] }
  0x37   : > { %2019 = vmatpush.bf16.msra.mxu3 %v4498_v38  ;;  %v4619_v60 = vld [vmem:[%s5034_s7 + $0x4c] sm:$0xf0]  ;;  %v4445_v61 = vld [vmem:[%s5034_s7 + $0x140] sm:$0xf]  ;;  %v4466_v62 = vor.u32 %v4653_v54, %v4463_v55  ;;  %v4617_v0 = vld [vmem:[%s5034_s7 + $0x44] sm:$0xf] }
  0x38   : > { %1513 = vmatpush.bf16.msra.mxu0 %v4350_v44  ;;  %v4651_v63 = vld [vmem:[%s5034_s7 + $0x14c] sm:$0xf0]  ;;  %v4319_v1 = vld [vmem:[%s5034_s7 + $0x50] sm:$0xf0]  ;;  %v4649_v2 = vld [vmem:[%s5034_s7 + $0x144] sm:$0xf]  ;;  %v4318_v4 = vor.u32 %v4619_v60, %v4317_v59 }
  0x39   : > { %1682 = vmatpush.bf16.msra.mxu1 %v4478_v45  ;;  %v4447_v3 = vld [vmem:[%s5034_s7 + $0x150] sm:$0xf0]  ;;  %v4446_v5 = vor.u32 %v4651_v63, %v4445_v61  ;;  %v4322_v6 = vor.u32 %v4617_v0, %v4319_v1  ;;  %v4301_v7 = vld [vmem:[%s5034_s7 + $0x20] sm:$0xf]  ;;  %v4615_v8 = vld [vmem:[%s5034_s7 + $0x2c] sm:$0xf0] }
  0x3a   : > { %1851 = vmatpush.bf16.msra.mxu2 %v4354_v46  ;;  %v4429_v9 = vld [vmem:[%s5034_s7 + $0x120] sm:$0xf]  ;;  %v4450_v10 = vor.u32 %v4649_v2, %v4447_v3  ;;  %v4647_v11 = vld [vmem:[%s5034_s7 + $0x12c] sm:$0xf0]  ;;  %v4613_v12 = vld [vmem:[%s5034_s7 + $0x24] sm:$0xf]  ;;  %v4302_v16 = vor.u32 %v4615_v8, %v4301_v7 }
  0x3b   : > { %2020 = vmatpush.bf16.msra.mxu3 %v4482_v50  ;;  %v4303_v13 = vld [vmem:[%s5034_s7 + $0x30] sm:$0xf0]  ;;  %v4645_v14 = vld [vmem:[%s5034_s7 + $0x124] sm:$0xf]  ;;  %v4285_v17 = vld [vmem:[%s5034_s7] sm:$0xf]  ;;  %v4430_v19 = vor.u32 %v4647_v11, %v4429_v9 }
  0x3c   : > { %1514 = vmatpush.bf16.msra.mxu0 %v4334_v56  ;;  %v4431_v15 = vld [vmem:[%s5034_s7 + $0x130] sm:$0xf0]  ;;  %v4611_v18 = vld [vmem:[%s5034_s7 + $0xc] sm:$0xf0]  ;;  %v4306_v20 = vor.u32 %v4613_v12, %v4303_v13  ;;  %v4413_v21 = vld [vmem:[%s5034_s7 + $0x100] sm:$0xf] }
  0x3d   : > { %1683 = vmatpush.bf16.msra.mxu1 %v4462_v57  ;;  %v4643_v22 = vld [vmem:[%s5034_s7 + $0x10c] sm:$0xf0]  ;;  %v4609_v23 = vld [vmem:[%s5034_s7 + $0x4] sm:$0xf]  ;;  %v4434_v24 = vor.u32 %v4645_v14, %v4431_v15  ;;  %v4287_v25 = vld [vmem:[%s5034_s7 + $0x10] sm:$0xf0]  ;;  %v4286_v31 = vor.u32 %v4611_v18, %v4285_v17 }
  0x3e   : > { %1852 = vmatpush.bf16.msra.mxu2 %v4338_v58  ;;  %v4641_v26 = vld [vmem:[%s5034_s7 + $0x104] sm:$0xf]  ;;  %v4415_v27 = vld [vmem:[%s5034_s7 + $0x110] sm:$0xf0]  ;;  %v4029_v28 = vld [vmem:[#allocation3] sm:$0xf]  ;;  %v4414_v35 = vor.u32 %v4643_v22, %v4413_v21  ;;  %v4290_v36 = vor.u32 %v4609_v23, %v4287_v25 }
  0x3f   : > { %2021 = vmatpush.bf16.msra.mxu3 %v4466_v62  ;;  %v4638_v29 = vld [vmem:[%s5034_s7 + $0xec] sm:$0xf]  ;;  %v4407_v30 = vld [vmem:[%s5034_s7 + $0xf8] sm:$0xf0]  ;;  %v4546_v32 = vld [vmem:[#allocation3 + $0x4] sm:$0xf0]  ;;  %v4418_v39 = vor.u32 %v4641_v26, %v4415_v27 }
  0x40   : > { %1515 = vmatpush.bf16.msra.mxu0 %v4318_v4  ;;  %v4670_v33 = vld [vmem:[%s5034_s7 + $0x1ec] sm:$0xf]  ;;  %v4535_v34 = vld [vmem:[%s5034_s7 + $0x1f8] sm:$0xf0]  ;;  %v4545_v37 = vld [vmem:[#allocation3 + $0x4] sm:$0xf]  ;;  %v4410_v40 = vor.u32 %v4638_v29, %v4407_v30  ;;  %v5110_v43 = vor.u32 %v4546_v32, %v4029_v28 }
  0x41   : > { %1684 = vmatpush.bf16.msra.mxu1 %v4446_v5  ;;  %v4031_v38 = vld [vmem:[#allocation3 + $0x8] sm:$0xf0]  ;;  %v4405_v41 = vld [vmem:[%s5034_s7 + $0xe8] sm:$0xf]  ;;  %v4640_v42 = vld [vmem:[%s5034_s7 + $0xf4] sm:$0xf0]  ;;  %v4538_v44 = vor.u32 %v4670_v33, %v4535_v34 }
  0x42   : > { %1853 = vmatpush.bf16.msra.mxu2 %v4322_v6  ;;  %v4533_v45 = vld [vmem:[%s5034_s7 + $0x1e8] sm:$0xf]  ;;  %v4672_v46 = vld [vmem:[%s5034_s7 + $0x1f4] sm:$0xf0]  ;;  %v5114_v47 = vor.u32 %v4545_v37, %v4031_v38  ;;  %v4406_v48 = vor.u32 %v4640_v42, %v4405_v41  ;;  %v4037_v50 = vld [vmem:[#allocation3 + $0x10] sm:$0xf] }
  0x43   : > { %2022 = vmatpush.bf16.msra.mxu3 %v4450_v10  ;;  %v4534_v49 = vor.u32 %v4672_v46, %v4533_v45  ;;  %v4548_v51 = vld [vmem:[#allocation3 + $0x14] sm:$0xf0]  ;;  %v4547_v52 = vld [vmem:[#allocation3 + $0x14] sm:$0xf]  ;;  %v4039_v53 = vld [vmem:[#allocation3 + $0x18] sm:$0xf0] }
  0x44   : > { %1516 = vmatpush.bf16.msra.mxu0 %v4302_v16  ;;  %v5120_v54 = vor.u32 %v4548_v51, %v4037_v50  ;;  %v5122_v55 = vor.u32 %v4547_v52, %v4039_v53  ;;  %v4045_v56 = vld [vmem:[#allocation3 + $0x20] sm:$0xf]  ;;  %v4550_v57 = vld [vmem:[#allocation3 + $0x24] sm:$0xf0]  ;;  %v4549_v58 = vld [vmem:[#allocation3 + $0x24] sm:$0xf] }
  0x45   : > { %1685 = vmatpush.bf16.msra.mxu1 %v4430_v19  ;;  %v4047_v59 = vld [vmem:[#allocation3 + $0x28] sm:$0xf0]  ;;  %v5128_v60 = vor.u32 %v4550_v57, %v4045_v56  ;;  %v4391_v63 = vld [vmem:[%s5034_s7 + $0xd8] sm:$0xf0]  ;;  %v4389_v3 = vld [vmem:[%s5034_s7 + $0xc8] sm:$0xf] }
  0x46   : > { %1854 = vmatpush.bf16.msra.mxu2 %v4306_v20  ;;  %v5130_v61 = vor.u32 %v4549_v58, %v4047_v59  ;;  %v4634_v62 = vld [vmem:[%s5034_s7 + $0xcc] sm:$0xf]  ;;  %v4519_v2 = vld [vmem:[%s5034_s7 + $0x1d8] sm:$0xf0]  ;;  %v4636_v4 = vld [vmem:[%s5034_s7 + $0xd4] sm:$0xf0] }
  0x47   : > { %2023 = vmatpush.bf16.msra.mxu3 %v4434_v24  ;;  %v4666_v0 = vld [vmem:[%s5034_s7 + $0x1cc] sm:$0xf]  ;;  %v4394_v1 = vor.u32 %v4634_v62, %v4391_v63  ;;  %v4390_v6 = vor.u32 %v4636_v4, %v4389_v3  ;;  %v4517_v7 = vld [vmem:[%s5034_s7 + $0x1c8] sm:$0xf]  ;;  %v4668_v8 = vld [vmem:[%s5034_s7 + $0x1d4] sm:$0xf0] }
  0x48   : > { %1517 = vmatpush.bf16.msra.mxu0 %v4286_v31  ;;  %v4522_v5 = vor.u32 %v4666_v0, %v4519_v2  ;;  %v4518_v9 = vor.u32 %v4668_v8, %v4517_v7  ;;  %v4053_v10 = vld [vmem:[#allocation3 + $0x30] sm:$0xf]  ;;  %v4552_v11 = vld [vmem:[#allocation3 + $0x34] sm:$0xf0]  ;;  %v4551_v12 = vld [vmem:[#allocation3 + $0x34] sm:$0xf] }
  0x49   : > { %1686 = vmatpush.bf16.msra.mxu1 %v4414_v35  ;;  %v4055_v13 = vld [vmem:[#allocation3 + $0x38] sm:$0xf0]  ;;  %v5144_v14 = vor.u32 %v4552_v11, %v4053_v10  ;;  %v4061_v16 = vld [vmem:[#allocation3 + $0x40] sm:$0xf]  ;;  %v4554_v17 = vld [vmem:[#allocation3 + $0x44] sm:$0xf0] }
  0x4a   : > { %1855 = vmatpush.bf16.msra.mxu2 %v4290_v36  ;;  %v5146_v15 = vor.u32 %v4551_v12, %v4055_v13  ;;  %v4553_v18 = vld [vmem:[#allocation3 + $0x44] sm:$0xf]  ;;  %v4063_v19 = vld [vmem:[#allocation3 + $0x48] sm:$0xf0]  ;;  %v5152_v20 = vor.u32 %v4554_v17, %v4061_v16  ;;  %v4069_v22 = vld [vmem:[#allocation3 + $0x50] sm:$0xf] }
  0x4b   : > { %2024 = vmatpush.bf16.msra.mxu3 %v4418_v39  ;;  %1518 = vmatmul.bf16.vlgmr.msra.gmra.mxu0 %v5110_v43  ;;  %v5154_v21 = vor.u32 %v4553_v18, %v4063_v19  ;;  %v4556_v23 = vld [vmem:[#allocation3 + $0x54] sm:$0xf0]  ;;  %v4555_v24 = vld [vmem:[#allocation3 + $0x54] sm:$0xf]  ;;  %v4071_v25 = vld [vmem:[#allocation3 + $0x58] sm:$0xf0] }
  0x4c   : > { %1687 = vmatmul.bf16.vlgmr.msra.gmra.mxu1 %v5114_v47  ;;  %2186 = vmatpush.bf16.msrb.mxu0 %v4406_v48  ;;  %v5160_v26 = vor.u32 %v4556_v23, %v4069_v22  ;;  %v5162_v27 = vor.u32 %v4555_v24, %v4071_v25  ;;  %v4077_v28 = vld [vmem:[#allocation3 + $0x60] sm:$0xf]  ;;  %v4558_v29 = vld [vmem:[#allocation3 + $0x64] sm:$0xf0]  ;;  %v4557_v30 = vld [vmem:[#allocation3 + $0x64] sm:$0xf] }
  0x4d   : > { %1856 = vmatmul.bf16.vlgmr.msra.gmra.mxu2 %v5110_v43  ;;  %2355 = vmatpush.bf16.msrb.mxu1 %v4534_v49  ;;  %v4079_v31 = vld [vmem:[#allocation3 + $0x68] sm:$0xf0]  ;;  %v5168_v32 = vor.u32 %v4558_v29, %v4077_v28  ;;  %v4375_v35 = vld [vmem:[%s5034_s7 + $0xb8] sm:$0xf0]  ;;  %v4560_v41 = vld [vmem:[#allocation3 + $0x74] sm:$0xf0] }
  0x4e   : > { %2524 = vmatpush.bf16.msrb.mxu2 %v4410_v40  ;;  %2025 = vmatmul.bf16.vlgmr.msra.gmra.mxu3 %v5114_v47  ;;  %v5170_v33 = vor.u32 %v4557_v30, %v4079_v31  ;;  %v4630_v34 = vld [vmem:[%s5034_s7 + $0xac] sm:$0xf]  ;;  %v4503_v38 = vld [vmem:[%s5034_s7 + $0x1b8] sm:$0xf0]  ;;  %v4085_v40 = vld [vmem:[#allocation3 + $0x70] sm:$0xf] }
  0x4f   : > { %2693 = vmatpush.bf16.msrb.mxu3 %v4538_v44  ;;  %v4662_v36 = vld [vmem:[%s5034_s7 + $0x1ac] sm:$0xf]  ;;  %v4378_v37 = vor.u32 %v4630_v34, %v4375_v35  ;;  %v4559_v42 = vld [vmem:[#allocation3 + $0x74] sm:$0xf]  ;;  %v4087_v44 = vld [vmem:[#allocation3 + $0x78] sm:$0xf0]  ;;  %v5184_v51 = vor.u32 %v4560_v41, %v4085_v40 }
  0x50   : > { %2187 = vmatpush.bf16.msrb.mxu0 %v4390_v6  ;;  %v4506_v39 = vor.u32 %v4662_v36, %v4503_v38  ;;  %v4373_v45 = vld [vmem:[%s5034_s7 + $0xa8] sm:$0xf]  ;;  %v4632_v46 = vld [vmem:[%s5034_s7 + $0xb4] sm:$0xf0]  ;;  %v5186_v53 = vor.u32 %v4559_v42, %v4087_v44  ;;  %v4093_v56 = vld [vmem:[#allocation3 + $0x80] sm:$0xf] }
  0x51   : > { %2356 = vmatpush.bf16.msrb.mxu1 %v4518_v9  ;;  %v4501_v48 = vld [vmem:[%s5034_s7 + $0x1a8] sm:$0xf]  ;;  %v4374_v49 = vor.u32 %v4632_v46, %v4373_v45  ;;  %v4664_v50 = vld [vmem:[%s5034_s7 + $0x1b4] sm:$0xf0]  ;;  %v4561_v58 = vld [vmem:[#allocation3 + $0x84] sm:$0xf] }
  0x52   : > { %2525 = vmatpush.bf16.msrb.mxu2 %v4394_v1  ;;  %v4502_v52 = vor.u32 %v4664_v50, %v4501_v48  ;;  %v4562_v57 = vld [vmem:[#allocation3 + $0x84] sm:$0xf0]  ;;  %v4095_v59 = vld [vmem:[#allocation3 + $0x88] sm:$0xf0]  ;;  %v4101_v9 = vld [vmem:[#allocation3 + $0x90] sm:$0xf] }
  0x53   : > { %2694 = vmatpush.bf16.msrb.mxu3 %v4522_v5  ;;  %v5192_v62 = vor.u32 %v4562_v57, %v4093_v56  ;;  %v5194_v0 = vor.u32 %v4561_v58, %v4095_v59  ;;  %v4564_v10 = vld [vmem:[#allocation3 + $0x94] sm:$0xf0]  ;;  %s5201_s19 = scalar_lea.vmem [#allocation8], %s4026_s17  ;;  %v4563_v11 = vld [vmem:[#allocation3 + $0x94] sm:$0xf]  ;;  %s4673_s24 = sshll.u32 %s4893_s12, 4 }
  0x54   : > { %2188 = vmatpush.bf16.msrb.mxu0 %v4374_v49  ;;  %v4103_v12 = vld [vmem:[#allocation3 + $0x98] sm:$0xf0]  ;;  %v5204_v16 = vor.u32 %v4564_v10, %v4101_v9  ;;  %v4566_v38 = vld [vmem:[#allocation3 + $0xa4] sm:$0xf0]  ;;  %v4111_v40 = vld [vmem:[#allocation3 + $0xa8] sm:$0xf0]  ;;  %s3904_s21 = scalar_lea.hbm %s5724_s2, %s4673_s24 }
  0x55   : > { %2357 = vmatpush.bf16.msrb.mxu1 %v4502_v52  ;;  %v5206_v19 = vor.u32 %v4563_v11, %v4103_v12  ;;  %v4626_v56 = vld [vmem:[%s5034_s7 + $0x8c] sm:$0xf]  ;;  %v4359_v57 = vld [vmem:[%s5034_s7 + $0x98] sm:$0xf0]  ;;  %v4117_v9 = vld [vmem:[#allocation3 + $0xb0] sm:$0xf] }
  0x56   : > { %2526 = vmatpush.bf16.msrb.mxu2 %v4378_v37  ;;  %v4109_v37 = vld [vmem:[#allocation3 + $0xa0] sm:$0xf]  ;;  %v4362_v58 = vor.u32 %v4626_v56, %v4359_v57  ;;  %v4658_v59 = vld [vmem:[%s5034_s7 + $0x18c] sm:$0xf]  ;;  %v4568_v10 = vld [vmem:[#allocation3 + $0xb4] sm:$0xf0] }
  0x57   : > { %2695 = vmatpush.bf16.msrb.mxu3 %v4506_v39  ;;  %v4565_v39 = vld [vmem:[#allocation3 + $0xa4] sm:$0xf]  ;;  %v5214_v42 = vor.u32 %v4566_v38, %v4109_v37  ;;  %v4567_v11 = vld [vmem:[#allocation3 + $0xb4] sm:$0xf]  ;;  %v4119_v12 = vld [vmem:[#allocation3 + $0xb8] sm:$0xf0] }
  0x58   : > { %v5216_v46 = vor.u32 %v4565_v39, %v4111_v40  ;;  %v4127_v56 = vld [vmem:[#allocation3 + $0xc8] sm:$0xf0]  ;;  %s3905_s22 = sshll.u32 %s5201_s19, 4  ;;  %s3907_s23 = sshll.u32 %s3904_s21, 4  ;;  %s3906_s22 = int_to_ptr.vmem [resolvable:$true] %s3905_s22  ;;  %s3908_s23 = int_to_ptr.hbm [resolvable:$true] %s3907_s23 }
  0x59   : > { %s3890_s12 = scalar_lea.sflag [#allocation5], %s5030_s30  ;;  %s4829_s25 = sshra.s32 %s3908_s23, 4  ;;  %s4830_s25 = int_to_ptr.hbm [resolvable:$true] %s4829_s25 }
  0x5a   : > { %2527 = vmatpush.bf16.msrb.mxu2 %v4362_v58  ;;  %s4831_s18 = scalar_lea.hbm %s4830_s25, 1024  ;;  %s4835_s28 = scalar_lea.hbm %s5724_s2, 2048 }
  0x5b   : > { %1523 = vmatmul.bf16.gmra.mxu0 %v5120_v54  ;;  %p4832_p1 = scmp.ne.s32.totalorder %s4830_s25, %s4831_s18  ;;  %p4836_p10 = scmp.lt.s32.totalorder %s4830_s25, %s5724_s2 }
  0x5c   : > { %1692 = vmatmul.bf16.gmra.mxu1 %v5122_v55  ;;  %p4837_p12 = scmp.lt.s32.totalorder %s4835_s28, %s4831_s18 }
  0x5d   : > { %1861 = vmatmul.bf16.gmra.mxu2 %v5120_v54  ;;  %p4833_p4 = pnand %p4832_p1, %p5006_p5 }
  0x5e   : > { %2030 = vmatmul.bf16.gmra.mxu3 %v5122_v55  ;;  %p4838_p13 = por %p4837_p12, %p4836_p10 }
  0x5f   : > { %p4834_p8 = pneg %p4833_p4 }
  0x61   : > { %p4839_p0 = pnand %p4838_p13, %p4834_p8 }
  0x6b   : > { %1528 = vmatmul.bf16.gmra.mxu0 %v5128_v60 }
  0x6c   : > { %1697 = vmatmul.bf16.gmra.mxu1 %v5130_v61 }
  0x6d   : > { %1866 = vmatmul.bf16.gmra.mxu2 %v5128_v60 }
  0x6e   : > { %2035 = vmatmul.bf16.gmra.mxu3 %v5130_v61 }
  0x7b   : > { %1533 = vmatmul.bf16.gmra.mxu0 %v5144_v14 }
  0x7c   : > { %1702 = vmatmul.bf16.gmra.mxu1 %v5146_v15 }
  0x7d   : > { %1871 = vmatmul.bf16.gmra.mxu2 %v5144_v14 }
  0x7e   : > { %2040 = vmatmul.bf16.gmra.mxu3 %v5146_v15 }
  0x8b   : > { %1538 = vmatmul.bf16.gmra.mxu0 %v5152_v20 }
  0x8c   : > { %1707 = vmatmul.bf16.gmra.mxu1 %v5154_v21 }
  0x8d   : > { %1876 = vmatmul.bf16.gmra.mxu2 %v5152_v20 }
  0x8e   : > { %2045 = vmatmul.bf16.gmra.mxu3 %v5154_v21 }
  0x9b   : > { %1543 = vmatmul.bf16.gmra.mxu0 %v5160_v26 }
  0x9c   : > { %1712 = vmatmul.bf16.gmra.mxu1 %v5162_v27 }
  0x9d   : > { %1881 = vmatmul.bf16.gmra.mxu2 %v5160_v26 }
  0x9e   : > { %2050 = vmatmul.bf16.gmra.mxu3 %v5162_v27 }
  0xab   : > { %1548 = vmatmul.bf16.gmra.mxu0 %v5168_v32 }
  0xac   : > { %1717 = vmatmul.bf16.gmra.mxu1 %v5170_v33 }
  0xad   : > { %1886 = vmatmul.bf16.gmra.mxu2 %v5168_v32 }
  0xae   : > { %2055 = vmatmul.bf16.gmra.mxu3 %v5170_v33 }
  0xbb   : > { %1553 = vmatmul.bf16.gmra.mxu0 %v5184_v51 }
  0xbc   : > { %1722 = vmatmul.bf16.gmra.mxu1 %v5186_v53 }
  0xbd   : > { %1891 = vmatmul.bf16.gmra.mxu2 %v5184_v51 }
  0xbe   : > { %2060 = vmatmul.bf16.gmra.mxu3 %v5186_v53 }
  0xc8   : > { %v1519_v63 = vpop.f32.mrf.mxu0 }
  0xc9   : > { %v1688_v1 = vpop.f32.mrf.mxu1 }
  0xca   : > { %v1689_v2 = vadd.f32 %v1688_v1, %v1519_v63  ;;  %v4487_v63 = vld [vmem:[%s5034_s7 + $0x198] sm:$0xf0] }
  0xcb   : > { %1558 = vmatmul.bf16.gmra.mxu0 %v5192_v62 }
  0xcc   : > { %1727 = vmatmul.bf16.gmra.mxu1 %v5194_v0 }
  0xcd   : > { %1896 = vmatmul.bf16.gmra.mxu2 %v5192_v62 }
  0xce   : > { %2065 = vmatmul.bf16.gmra.mxu3 %v5194_v0 }
  0xd0   : > { %v1857_v3 = vpop.f32.mrf.mxu2  ;;  %v1521_v5 = vpop.f32.mrf.mxu0 }
  0xd1   : > { %v2026_v4 = vpop.f32.mrf.mxu3  ;;  %v1690_v7 = vpop.f32.mrf.mxu1 }
  0xd2   : > { %v2027_v6 = vadd.f32 %v2026_v4, %v1857_v3  ;;  %v1691_v22 = vadd.f32 %v1690_v7, %v1521_v5  ;;  %v4490_v3 = vor.u32 %v4658_v59, %v4487_v63 }
  0xd4   : > { %v3633_v8 = vpack.c.bf16 %v2027_v6, %v1689_v2  ;;  %2696 = vmatpush.bf16.msrb.mxu3 %v4490_v3 }
  0xd6   : > { %3761 = vst [vmem:[%s5201_s19] sm:$0xff] %v3633_v8 }
  0xd8   : > { %v1859_v13 = vpop.f32.mrf.mxu2  ;;  %v1524_v18 = vpop.f32.mrf.mxu0 }
  0xd9   : > { %v2028_v17 = vpop.f32.mrf.mxu3  ;;  %v1693_v24 = vpop.f32.mrf.mxu1 }
  0xda   : > { %v2029_v23 = vadd.f32 %v2028_v17, %v1859_v13  ;;  %v1694_v28 = vadd.f32 %v1693_v24, %v1524_v18  ;;  %v4357_v13 = vld [vmem:[%s5034_s7 + $0x88] sm:$0xf]  ;;  %v4628_v17 = vld [vmem:[%s5034_s7 + $0x94] sm:$0xf0] }
  0xdb   : > { %1563 = vmatmul.bf16.gmra.mxu0 %v5204_v16  ;;  %v4358_v18 = vor.u32 %v4628_v17, %v4357_v13  ;;  %v4133_v13 = vld [vmem:[#allocation3 + $0xd0] sm:$0xf]  ;;  %v4572_v17 = vld [vmem:[#allocation3 + $0xd4] sm:$0xf0] }
  0xdc   : > { %v3635_v25 = vpack.c.bf16 %v2029_v23, %v1691_v22  ;;  %1732 = vmatmul.bf16.gmra.mxu1 %v5206_v19  ;;  %v4485_v22 = vld [vmem:[%s5034_s7 + $0x188] sm:$0xf]  ;;  %v4660_v23 = vld [vmem:[%s5034_s7 + $0x194] sm:$0xf0] }
  0xdd   : > { %1901 = vmatmul.bf16.gmra.mxu2 %v5204_v16  ;;  %2189 = vmatpush.bf16.msrb.mxu0 %v4358_v18  ;;  %v4571_v18 = vld [vmem:[#allocation3 + $0xd4] sm:$0xf] }
  0xde   : > { %3763 = vst [vmem:[%s5201_s19 + $0x10] sm:$0xff] %v3635_v25  ;;  %2070 = vmatmul.bf16.gmra.mxu3 %v5206_v19  ;;  %v5232_v25 = vor.u32 %v4568_v10, %v4117_v9 }
  0xe0   : > { %v1862_v29 = vpop.f32.mrf.mxu2  ;;  %v1526_v31 = vpop.f32.mrf.mxu0 }
  0xe1   : > { %v2031_v30 = vpop.f32.mrf.mxu3  ;;  %v1695_v35 = vpop.f32.mrf.mxu1 }
  0xe2   : > { %v2032_v34 = vadd.f32 %v2031_v30, %v1862_v29  ;;  %v1696_v48 = vadd.f32 %v1695_v35, %v1526_v31  ;;  %v5234_v31 = vor.u32 %v4567_v11, %v4119_v12 }
  0xe4   : > { %v3637_v36 = vpack.c.bf16 %v2032_v34, %v1694_v28  ;;  %v4486_v28 = vor.u32 %v4660_v23, %v4485_v22  ;;  %v4135_v22 = vld [vmem:[#allocation3 + $0xd8] sm:$0xf0] }
  0xe6   : > { %3765 = vst [vmem:[%s5201_s19 + $0x20] sm:$0xff] %v3637_v36  ;;  %2358 = vmatpush.bf16.msrb.mxu1 %v4486_v28 }
  0xe8   : > { %v1864_v41 = vpop.f32.mrf.mxu2  ;;  %v1529_v45 = vpop.f32.mrf.mxu0 }
  0xe9   : > { %v2033_v44 = vpop.f32.mrf.mxu3  ;;  %v1698_v50 = vpop.f32.mrf.mxu1 }
  0xea   : > { %v2034_v49 = vadd.f32 %v2033_v44, %v1864_v41  ;;  %v1699_v1 = vadd.f32 %v1698_v50, %v1529_v45  ;;  %v4570_v50 = vld [vmem:[#allocation3 + $0xc4] sm:$0xf0] }
  0xeb   : > { %1568 = vmatmul.bf16.gmra.mxu0 %v5214_v42 }
  0xec   : > { %v3639_v52 = vpack.c.bf16 %v2034_v49, %v1696_v48  ;;  %1737 = vmatmul.bf16.gmra.mxu1 %v5216_v46  ;;  %v4125_v49 = vld [vmem:[#allocation3 + $0xc0] sm:$0xf] }
  0xed   : > { %1906 = vmatmul.bf16.gmra.mxu2 %v5214_v42  ;;  %v5242_v58 = vor.u32 %v4570_v50, %v4125_v49  ;;  %v4141_v49 = vld [vmem:[#allocation3 + $0xe0] sm:$0xf]  ;;  %v4574_v50 = vld [vmem:[#allocation3 + $0xe4] sm:$0xf0] }
  0xee   : > { %3767 = vst [vmem:[%s5201_s19 + $0x30] sm:$0xff] %v3639_v52  ;;  %2075 = vmatmul.bf16.gmra.mxu3 %v5216_v46  ;;  %v4569_v52 = vld [vmem:[#allocation3 + $0xc4] sm:$0xf] }
  0xf0   : > { %v1867_v2 = vpop.f32.mrf.mxu2  ;;  %v1531_v5 = vpop.f32.mrf.mxu0 }
  0xf1   : > { %v2036_v4 = vpop.f32.mrf.mxu3  ;;  %v1700_v7 = vpop.f32.mrf.mxu1 }
  0xf2   : > { %v2037_v6 = vadd.f32 %v2036_v4, %v1867_v2  ;;  %v1701_v34 = vadd.f32 %v1700_v7, %v1531_v5 }
  0xf4   : > { %v3641_v8 = vpack.c.bf16 %v2037_v6, %v1699_v1  ;;  %v5244_v1 = vor.u32 %v4569_v52, %v4127_v56  ;;  %v4573_v52 = vld [vmem:[#allocation3 + $0xe4] sm:$0xf]  ;;  %v4143_v56 = vld [vmem:[#allocation3 + $0xe8] sm:$0xf0] }
  0xf6   : > { %3769 = vst [vmem:[%s5201_s19 + $0x40] sm:$0xff] %v3641_v8 }
  0xf8   : > { %v1869_v24 = vpop.f32.mrf.mxu2  ;;  %v1534_v30 = vpop.f32.mrf.mxu0 }
  0xf9   : > { %v2038_v29 = vpop.f32.mrf.mxu3  ;;  %v1703_v36 = vpop.f32.mrf.mxu1 }
  0xfa   : > { %v2039_v35 = vadd.f32 %v2038_v29, %v1869_v24  ;;  %v1704_v38 = vadd.f32 %v1703_v36, %v1534_v30  ;;  %v5252_v24 = vor.u32 %v4572_v17, %v4133_v13  ;;  %v5254_v30 = vor.u32 %v4571_v18, %v4135_v22 }
  0xfb   : > { %1573 = vmatmul.bf16.gmra.mxu0 %v5232_v25 }
  0xfc   : > { %v3643_v37 = vpack.c.bf16 %v2039_v35, %v1701_v34  ;;  %1742 = vmatmul.bf16.gmra.mxu1 %v5234_v31 }
  0xfd   : > { %1911 = vmatmul.bf16.gmra.mxu2 %v5232_v25 }
  0xfe   : > { %3771 = vst [vmem:[%s5201_s19 + $0x50] sm:$0xff] %v3643_v37  ;;  %2080 = vmatmul.bf16.gmra.mxu3 %v5234_v31 }
 0x100   : > { %v1872_v39 = vpop.f32.mrf.mxu2  ;;  %v1536_v41 = vpop.f32.mrf.mxu0 }
 0x101   : > { %v2041_v40 = vpop.f32.mrf.mxu3  ;;  %v1705_v45 = vpop.f32.mrf.mxu1 }
 0x102   : > { %v2042_v44 = vadd.f32 %v2041_v40, %v1872_v39  ;;  %v1706_v2 = vadd.f32 %v1705_v45, %v1536_v41 }
 0x104   : > { %v3645_v48 = vpack.c.bf16 %v2042_v44, %v1704_v38 }
 0x106   : > { %3773 = vst [vmem:[%s5201_s19 + $0x60] sm:$0xff] %v3645_v48 }
 0x108   : > { %v1874_v57 = vpop.f32.mrf.mxu2  ;;  %v1539_v63 = vpop.f32.mrf.mxu0 }
 0x109   : > { %v2043_v59 = vpop.f32.mrf.mxu3  ;;  %v1708_v4 = vpop.f32.mrf.mxu1 }
 0x10a   : > { %v2044_v3 = vadd.f32 %v2043_v59, %v1874_v57  ;;  %v1709_v6 = vadd.f32 %v1708_v4, %v1539_v63  ;;  %v5262_v59 = vor.u32 %v4574_v50, %v4141_v49 }
 0x10b   : > { %1578 = vmatmul.bf16.gmra.mxu0 %v5242_v58 }
 0x10c   : > { %v3647_v5 = vpack.c.bf16 %v2044_v3, %v1706_v2  ;;  %1747 = vmatmul.bf16.gmra.mxu1 %v5244_v1  ;;  %v5264_v3 = vor.u32 %v4573_v52, %v4143_v56 }
 0x10d   : > { %1916 = vmatmul.bf16.gmra.mxu2 %v5242_v58 }
 0x10e   : > { %3775 = vst [vmem:[%s5201_s19 + $0x70] sm:$0xff] %v3647_v5  ;;  %2085 = vmatmul.bf16.gmra.mxu3 %v5244_v1 }
 0x110   : > { %v1877_v7 = vpop.f32.mrf.mxu2  ;;  %v1541_v9 = vpop.f32.mrf.mxu0 }
 0x111   : > { %v2046_v8 = vpop.f32.mrf.mxu3  ;;  %v1710_v11 = vpop.f32.mrf.mxu1 }
 0x112   : > { %v2047_v10 = vadd.f32 %v2046_v8, %v1877_v7  ;;  %v1711_v34 = vadd.f32 %v1710_v11, %v1541_v9  ;;  %v4622_v8 = vld [vmem:[%s5034_s7 + $0x6c] sm:$0xf]  ;;  %v4343_v9 = vld [vmem:[%s5034_s7 + $0x78] sm:$0xf0] }
 0x113   : > { %v4654_v11 = vld [vmem:[%s5034_s7 + $0x16c] sm:$0xf] }
 0x114   : > { %v3649_v12 = vpack.c.bf16 %v2047_v10, %v1709_v6  ;;  %v4346_v10 = vor.u32 %v4622_v8, %v4343_v9 }
 0x116   : > { %3777 = vst [vmem:[%s5201_s19 + $0x80] sm:$0xff] %v3649_v12  ;;  %v4471_v12 = vld [vmem:[%s5034_s7 + $0x178] sm:$0xf0]  ;;  %2528 = vmatpush.bf16.msrb.mxu2 %v4346_v10 }
 0x117   : > { %v4474_v18 = vor.u32 %v4654_v11, %v4471_v12 }
 0x118   : > { %v1879_v23 = vpop.f32.mrf.mxu2  ;;  %v1544_v29 = vpop.f32.mrf.mxu0 }
 0x119   : > { %v2048_v28 = vpop.f32.mrf.mxu3  ;;  %v1713_v36 = vpop.f32.mrf.mxu1  ;;  %2697 = vmatpush.bf16.msrb.mxu3 %v4474_v18  ;;  %v4577_v18 = vld [vmem:[#allocation3 + $0x104] sm:$0xf] }
 0x11a   : > { %v2049_v35 = vadd.f32 %v2048_v28, %v1879_v23  ;;  %v1714_v38 = vadd.f32 %v1713_v36, %v1544_v29  ;;  %v4576_v36 = vld [vmem:[#allocation3 + $0xf4] sm:$0xf0] }
 0x11b   : > { %1583 = vmatmul.bf16.gmra.mxu0 %v5252_v24 }
 0x11c   : > { %v3651_v37 = vpack.c.bf16 %v2049_v35, %v1711_v34  ;;  %1752 = vmatmul.bf16.gmra.mxu1 %v5254_v30  ;;  %v4149_v35 = vld [vmem:[#allocation3 + $0xf0] sm:$0xf] }
 0x11d   : > { %1921 = vmatmul.bf16.gmra.mxu2 %v5252_v24  ;;  %v5280_v49 = vor.u32 %v4576_v36, %v4149_v35 }
 0x11e   : > { %3779 = vst [vmem:[%s5201_s19 + $0x90] sm:$0xff] %v3651_v37  ;;  %2090 = vmatmul.bf16.gmra.mxu3 %v5254_v30  ;;  %v4575_v37 = vld [vmem:[#allocation3 + $0xf4] sm:$0xf] }
 0x120   : > { %v1882_v39 = vpop.f32.mrf.mxu2  ;;  %v1546_v41 = vpop.f32.mrf.mxu0 }
 0x121   : > { %v2051_v40 = vpop.f32.mrf.mxu3  ;;  %v1715_v45 = vpop.f32.mrf.mxu1 }
 0x122   : > { %v2052_v44 = vadd.f32 %v2051_v40, %v1882_v39  ;;  %v1716_v4 = vadd.f32 %v1715_v45, %v1546_v41  ;;  %v4341_v39 = vld [vmem:[%s5034_s7 + $0x68] sm:$0xf]  ;;  %v4624_v40 = vld [vmem:[%s5034_s7 + $0x74] sm:$0xf0] }
 0x123   : > { %v4342_v41 = vor.u32 %v4624_v40, %v4341_v39  ;;  %v4656_v45 = vld [vmem:[%s5034_s7 + $0x174] sm:$0xf0] }
 0x124   : > { %v3653_v48 = vpack.c.bf16 %v2052_v44, %v1714_v38  ;;  %v4151_v38 = vld [vmem:[#allocation3 + $0xf8] sm:$0xf0]  ;;  %v4469_v44 = vld [vmem:[%s5034_s7 + $0x168] sm:$0xf] }
 0x125   : > { %v4470_v50 = vor.u32 %v4656_v45, %v4469_v44  ;;  %2190 = vmatpush.bf16.msrb.mxu0 %v4342_v41 }
 0x126   : > { %3781 = vst [vmem:[%s5201_s19 + $0xa0] sm:$0xff] %v3653_v48 }
 0x127   : > { %2359 = vmatpush.bf16.msrb.mxu1 %v4470_v50 }
 0x128   : > { %v1884_v57 = vpop.f32.mrf.mxu2  ;;  %v1549_v2 = vpop.f32.mrf.mxu0 }
 0x129   : > { %v2053_v63 = vpop.f32.mrf.mxu3  ;;  %v1718_v6 = vpop.f32.mrf.mxu1 }
 0x12a   : > { %v2054_v5 = vadd.f32 %v2053_v63, %v1884_v57  ;;  %v1719_v13 = vadd.f32 %v1718_v6, %v1549_v2  ;;  %v5282_v57 = vor.u32 %v4575_v37, %v4151_v38 }
 0x12b   : > { %1588 = vmatmul.bf16.gmra.mxu0 %v5262_v59 }
 0x12c   : > { %v3655_v7 = vpack.c.bf16 %v2054_v5, %v1716_v4  ;;  %1757 = vmatmul.bf16.gmra.mxu1 %v5264_v3 }
 0x12d   : > { %1926 = vmatmul.bf16.gmra.mxu2 %v5262_v59 }
 0x12e   : > { %3783 = vst [vmem:[%s5201_s19 + $0xb0] sm:$0xff] %v3655_v7  ;;  %2095 = vmatmul.bf16.gmra.mxu3 %v5264_v3 }
 0x130   : > { %v1887_v17 = vpop.f32.mrf.mxu2  ;;  %v1551_v23 = vpop.f32.mrf.mxu0 }
 0x131   : > { %v2056_v22 = vpop.f32.mrf.mxu3  ;;  %v1720_v29 = vpop.f32.mrf.mxu1 }
 0x132   : > { %v2057_v28 = vadd.f32 %v2056_v22, %v1887_v17  ;;  %v1721_v63 = vadd.f32 %v1720_v29, %v1551_v23  ;;  %v4578_v17 = vld [vmem:[#allocation3 + $0x104] sm:$0xf0]  ;;  %v4159_v22 = vld [vmem:[#allocation3 + $0x108] sm:$0xf0] }
 0x133   : > { %v5292_v35 = vor.u32 %v4577_v18, %v4159_v22 }
 0x134   : > { %v3657_v34 = vpack.c.bf16 %v2057_v28, %v1719_v13  ;;  %v4157_v13 = vld [vmem:[#allocation3 + $0x100] sm:$0xf] }
 0x135   : > { %v5290_v28 = vor.u32 %v4578_v17, %v4157_v13 }
 0x136   : > { %3785 = vst [vmem:[%s5201_s19 + $0xc0] sm:$0xff] %v3657_v34 }
 0x138   : > { %v1889_v48 = vpop.f32.mrf.mxu2  ;;  %v1554_v56 = vpop.f32.mrf.mxu0 }
 0x139   : > { %v2058_v52 = vpop.f32.mrf.mxu3  ;;  %v1723_v4 = vpop.f32.mrf.mxu1 }
 0x13a   : > { %v2059_v2 = vadd.f32 %v2058_v52, %v1889_v48  ;;  %v1724_v6 = vadd.f32 %v1723_v4, %v1554_v56  ;;  %v4165_v56 = vld [vmem:[#allocation3 + $0x110] sm:$0xf]  ;;  %v4167_v4 = vld [vmem:[#allocation3 + $0x118] sm:$0xf0] }
 0x13b   : > { %1593 = vmatmul.bf16.gmra.mxu0 %v5280_v49 }
 0x13c   : > { %v3659_v5 = vpack.c.bf16 %v2059_v2, %v1721_v63  ;;  %1762 = vmatmul.bf16.gmra.mxu1 %v5282_v57  ;;  %v4580_v63 = vld [vmem:[#allocation3 + $0x114] sm:$0xf0]  ;;  %v4579_v2 = vld [vmem:[#allocation3 + $0x114] sm:$0xf] }
 0x13d   : > { %1931 = vmatmul.bf16.gmra.mxu2 %v5280_v49 }
 0x13e   : > { %3787 = vst [vmem:[%s5201_s19 + $0xd0] sm:$0xff] %v3659_v5  ;;  %2100 = vmatmul.bf16.gmra.mxu3 %v5282_v57 }
 0x140   : > { %v1892_v7 = vpop.f32.mrf.mxu2  ;;  %v1556_v9 = vpop.f32.mrf.mxu0 }
 0x141   : > { %v2061_v8 = vpop.f32.mrf.mxu3  ;;  %v1725_v11 = vpop.f32.mrf.mxu1 }
 0x142   : > { %v2062_v10 = vadd.f32 %v2061_v8, %v1892_v7  ;;  %v1726_v36 = vadd.f32 %v1725_v11, %v1556_v9  ;;  %v5302_v9 = vor.u32 %v4579_v2, %v4167_v4  ;;  %v4618_v4 = vld [vmem:[%s5034_s7 + $0x4c] sm:$0xf] }
 0x144   : > { %v3661_v12 = vpack.c.bf16 %v2062_v10, %v1724_v6  ;;  %v5300_v6 = vor.u32 %v4580_v63, %v4165_v56 }
 0x146   : > { %3789 = vst [vmem:[%s5201_s19 + $0xe0] sm:$0xff] %v3661_v12 }
 0x148   : > { %v1894_v23 = vpop.f32.mrf.mxu2  ;;  %v1559_v34 = vpop.f32.mrf.mxu0 }
 0x149   : > { %v2063_v29 = vpop.f32.mrf.mxu3  ;;  %v1728_v38 = vpop.f32.mrf.mxu1 }
 0x14a   : > { %v2064_v37 = vadd.f32 %v2063_v29, %v1894_v23  ;;  %v1729_v40 = vadd.f32 %v1728_v38, %v1559_v34  ;;  %v4582_v38 = vld [vmem:[#allocation3 + $0x124] sm:$0xf0] }
 0x14b   : > { %1598 = vmatmul.bf16.gmra.mxu0 %v5290_v28 }
 0x14c   : > { %v3663_v39 = vpack.c.bf16 %v2064_v37, %v1726_v36  ;;  %1767 = vmatmul.bf16.gmra.mxu1 %v5292_v35  ;;  %v4173_v37 = vld [vmem:[#allocation3 + $0x120] sm:$0xf] }
 0x14d   : > { %1936 = vmatmul.bf16.gmra.mxu2 %v5290_v28 }
 0x14e   : > { %3791 = vst [vmem:[%s5201_s19 + $0xf0] sm:$0xff] %v3663_v39  ;;  %2105 = vmatmul.bf16.gmra.mxu3 %v5292_v35  ;;  %v4581_v39 = vld [vmem:[#allocation3 + $0x124] sm:$0xf] }
 0x150   : > { %v1897_v41 = vpop.f32.mrf.mxu2  ;;  %v1561_v45 = vpop.f32.mrf.mxu0 }
 0x151   : > { %v2066_v44 = vpop.f32.mrf.mxu3  ;;  %v1730_v50 = vpop.f32.mrf.mxu1 }
 0x152   : > { %v2067_v48 = vadd.f32 %v2066_v44, %v1897_v41  ;;  %v1731_v10 = vadd.f32 %v1730_v50, %v1561_v45  ;;  %v5310_v44 = vor.u32 %v4582_v38, %v4173_v37  ;;  %v4583_v37 = vld [vmem:[#allocation3 + $0x134] sm:$0xf]  ;;  %v4183_v38 = vld [vmem:[#allocation3 + $0x138] sm:$0xf0] }
 0x154   : > { %v3665_v52 = vpack.c.bf16 %v2067_v48, %v1729_v40  ;;  %v4175_v40 = vld [vmem:[#allocation3 + $0x128] sm:$0xf0] }
 0x155   : > { %v5312_v50 = vor.u32 %v4581_v39, %v4175_v40  ;;  %v4325_v39 = vld [vmem:[%s5034_s7 + $0x48] sm:$0xf]  ;;  %v4620_v40 = vld [vmem:[%s5034_s7 + $0x54] sm:$0xf0] }
 0x156   : > { %3793 = vst [vmem:[%s5201_s19 + $0x100] sm:$0xff] %v3665_v52 }
 0x158   : > { %v1899_v5 = vpop.f32.mrf.mxu2  ;;  %v1564_v8 = vpop.f32.mrf.mxu0 }
 0x159   : > { %v2068_v7 = vpop.f32.mrf.mxu3  ;;  %v1733_v12 = vpop.f32.mrf.mxu1 }
 0x15a   : > { %v2069_v11 = vadd.f32 %v2068_v7, %v1899_v5  ;;  %v1734_v17 = vadd.f32 %v1733_v12, %v1564_v8  ;;  %v4327_v5 = vld [vmem:[%s5034_s7 + $0x58] sm:$0xf0]  ;;  %v4650_v8 = vld [vmem:[%s5034_s7 + $0x14c] sm:$0xf] }
 0x15b   : > { %1603 = vmatmul.bf16.gmra.mxu0 %v5300_v6  ;;  %v4330_v7 = vor.u32 %v4618_v4, %v4327_v5  ;;  %v5330_v5 = vor.u32 %v4583_v37, %v4183_v38  ;;  %v4585_v37 = vld [vmem:[#allocation3 + $0x144] sm:$0xf]  ;;  %v4191_v38 = vld [vmem:[#allocation3 + $0x148] sm:$0xf0] }
 0x15c   : > { %v3667_v13 = vpack.c.bf16 %v2069_v11, %v1731_v10  ;;  %1772 = vmatmul.bf16.gmra.mxu1 %v5302_v9  ;;  %v4455_v10 = vld [vmem:[%s5034_s7 + $0x158] sm:$0xf0] }
 0x15d   : > { %1941 = vmatmul.bf16.gmra.mxu2 %v5300_v6 }
 0x15e   : > { %3795 = vst [vmem:[%s5201_s19 + $0x110] sm:$0xff] %v3667_v13  ;;  %2110 = vmatmul.bf16.gmra.mxu3 %v5302_v9  ;;  %v4458_v13 = vor.u32 %v4650_v8, %v4455_v10  ;;  %2529 = vmatpush.bf16.msrb.mxu2 %v4330_v7 }
 0x160   : > { %v1902_v18 = vpop.f32.mrf.mxu2  ;;  %v1566_v23 = vpop.f32.mrf.mxu0  ;;  %2698 = vmatpush.bf16.msrb.mxu3 %v4458_v13 }
 0x161   : > { %v2071_v22 = vpop.f32.mrf.mxu3  ;;  %v1735_v34 = vpop.f32.mrf.mxu1 }
 0x162   : > { %v2072_v29 = vadd.f32 %v2071_v22, %v1902_v18  ;;  %v1736_v52 = vadd.f32 %v1735_v34, %v1566_v23  ;;  %v4181_v34 = vld [vmem:[#allocation3 + $0x130] sm:$0xf] }
 0x164   : > { %v3669_v36 = vpack.c.bf16 %v2072_v29, %v1734_v17 }
 0x166   : > { %3797 = vst [vmem:[%s5201_s19 + $0x120] sm:$0xff] %v3669_v36  ;;  %v4584_v36 = vld [vmem:[#allocation3 + $0x134] sm:$0xf0] }
 0x168   : > { %v1904_v41 = vpop.f32.mrf.mxu2  ;;  %v1569_v48 = vpop.f32.mrf.mxu0 }
 0x169   : > { %v2073_v45 = vpop.f32.mrf.mxu3  ;;  %v1738_v63 = vpop.f32.mrf.mxu1 }
 0x16a   : > { %v2074_v56 = vadd.f32 %v2073_v45, %v1904_v41  ;;  %v1739_v11 = vadd.f32 %v1738_v63, %v1569_v48  ;;  %v4326_v41 = vor.u32 %v4620_v40, %v4325_v39  ;;  %v4453_v45 = vld [vmem:[%s5034_s7 + $0x148] sm:$0xf]  ;;  %v4652_v48 = vld [vmem:[%s5034_s7 + $0x154] sm:$0xf0] }
 0x16b   : > { %1608 = vmatmul.bf16.gmra.mxu0 %v5310_v44  ;;  %v4454_v63 = vor.u32 %v4652_v48, %v4453_v45  ;;  %v5340_v48 = vor.u32 %v4585_v37, %v4191_v38 }
 0x16c   : > { %v3671_v2 = vpack.c.bf16 %v2074_v56, %v1736_v52  ;;  %1777 = vmatmul.bf16.gmra.mxu1 %v5312_v50  ;;  %v5328_v56 = vor.u32 %v4584_v36, %v4181_v34  ;;  %2191 = vmatpush.bf16.msrb.mxu0 %v4326_v41  ;;  %v4189_v34 = vld [vmem:[#allocation3 + $0x140] sm:$0xf]  ;;  %v4586_v36 = vld [vmem:[#allocation3 + $0x144] sm:$0xf0] }
 0x16d   : > { %1946 = vmatmul.bf16.gmra.mxu2 %v5310_v44  ;;  %2360 = vmatpush.bf16.msrb.mxu1 %v4454_v63  ;;  %v5338_v40 = vor.u32 %v4586_v36, %v4189_v34 }
 0x16e   : > { %3799 = vst [vmem:[%s5201_s19 + $0x130] sm:$0xff] %v3671_v2  ;;  %2115 = vmatmul.bf16.gmra.mxu3 %v5312_v50 }
 0x170   : > { %v1907_v12 = vpop.f32.mrf.mxu2  ;;  %v1571_v18 = vpop.f32.mrf.mxu0 }
 0x171   : > { %v2076_v17 = vpop.f32.mrf.mxu3  ;;  %v1740_v23 = vpop.f32.mrf.mxu1 }
 0x172   : > { %v2077_v22 = vadd.f32 %v2076_v17, %v1907_v12  ;;  %v1741_v7 = vadd.f32 %v1740_v23, %v1571_v18 }
 0x174   : > { %v3673_v29 = vpack.c.bf16 %v2077_v22, %v1739_v11 }
 0x176   : > { %3801 = vst [vmem:[%s5201_s19 + $0x140] sm:$0xff] %v3673_v29 }
 0x178   : > { %v1909_v52 = vpop.f32.mrf.mxu2  ;;  %v1574_v4 = vpop.f32.mrf.mxu0 }
 0x179   : > { %v2078_v2 = vpop.f32.mrf.mxu3  ;;  %v1743_v10 = vpop.f32.mrf.mxu1 }
 0x17a   : > { %v2079_v8 = vadd.f32 %v2078_v2, %v1909_v52  ;;  %v1744_v12 = vadd.f32 %v1743_v10, %v1574_v4 }
 0x17b   : > { %1613 = vmatmul.bf16.gmra.mxu0 %v5328_v56 }
 0x17c   : > { %v3675_v11 = vpack.c.bf16 %v2079_v8, %v1741_v7  ;;  %1782 = vmatmul.bf16.gmra.mxu1 %v5330_v5 }
 0x17d   : > { %1951 = vmatmul.bf16.gmra.mxu2 %v5328_v56 }
 0x17e   : > { %3803 = vst [vmem:[%s5201_s19 + $0x150] sm:$0xff] %v3675_v11  ;;  %2120 = vmatmul.bf16.gmra.mxu3 %v5330_v5 }
 0x180   : > { %v1912_v13 = vpop.f32.mrf.mxu2  ;;  %v1576_v22 = vpop.f32.mrf.mxu0 }
 0x181   : > { %v2081_v17 = vpop.f32.mrf.mxu3  ;;  %v1745_v18 = vpop.f32.mrf.mxu1 }
 0x182   : > { %v2082_v29 = vadd.f32 %v2081_v17, %v1912_v13  ;;  %v1746_v52 = vadd.f32 %v1745_v18, %v1576_v22  ;;  %v4197_v22 = vld [vmem:[#allocation3 + $0x150] sm:$0xf]  ;;  %v4587_v18 = vld [vmem:[#allocation3 + $0x154] sm:$0xf] }
 0x184   : > { %v3677_v23 = vpack.c.bf16 %v2082_v29, %v1744_v12  ;;  %v4588_v29 = vld [vmem:[#allocation3 + $0x154] sm:$0xf0] }
 0x185   : > { %v5348_v36 = vor.u32 %v4588_v29, %v4197_v22  ;;  %v4589_v22 = vld [vmem:[#allocation3 + $0x164] sm:$0xf]  ;;  %v4207_v29 = vld [vmem:[#allocation3 + $0x168] sm:$0xf0] }
 0x186   : > { %3805 = vst [vmem:[%s5201_s19 + $0x160] sm:$0xff] %v3677_v23  ;;  %v4199_v23 = vld [vmem:[#allocation3 + $0x158] sm:$0xf0] }
 0x188   : > { %v1914_v39 = vpop.f32.mrf.mxu2  ;;  %v1579_v45 = vpop.f32.mrf.mxu0 }
 0x189   : > { %v2083_v41 = vpop.f32.mrf.mxu3  ;;  %v1748_v2 = vpop.f32.mrf.mxu1 }
 0x18a   : > { %v2084_v63 = vadd.f32 %v2083_v41, %v1914_v39  ;;  %v1749_v7 = vadd.f32 %v1748_v2, %v1579_v45  ;;  %v5350_v39 = vor.u32 %v4587_v18, %v4199_v23 }
 0x18b   : > { %1618 = vmatmul.bf16.gmra.mxu0 %v5338_v40 }
 0x18c   : > { %v3679_v4 = vpack.c.bf16 %v2084_v63, %v1746_v52  ;;  %1787 = vmatmul.bf16.gmra.mxu1 %v5340_v48  ;;  %5766 = vst [vmem:[#allocation12_spill] sm:$0xff] %v5350_v39 }
 0x18d   : > { %1956 = vmatmul.bf16.gmra.mxu2 %v5338_v40 }
 0x18e   : > { %3807 = vst [vmem:[%s5201_s19 + $0x170] sm:$0xff] %v3679_v4  ;;  %2125 = vmatmul.bf16.gmra.mxu3 %v5340_v48 }
 0x190   : > { %v1917_v8 = vpop.f32.mrf.mxu2  ;;  %v1581_v11 = vpop.f32.mrf.mxu0 }
 0x191   : > { %v2086_v10 = vpop.f32.mrf.mxu3  ;;  %v1750_v13 = vpop.f32.mrf.mxu1 }
 0x192   : > { %v2087_v12 = vadd.f32 %v2086_v10, %v1917_v8  ;;  %v1751_v41 = vadd.f32 %v1750_v13, %v1581_v11  ;;  %v4205_v13 = vld [vmem:[#allocation3 + $0x160] sm:$0xf] }
 0x194   : > { %v3681_v17 = vpack.c.bf16 %v2087_v12, %v1749_v7 }
 0x196   : > { %3809 = vst [vmem:[%s5201_s19 + $0x180] sm:$0xff] %v3681_v17  ;;  %v4590_v17 = vld [vmem:[#allocation3 + $0x164] sm:$0xf0] }
 0x197   : > { %v5358_v23 = vor.u32 %v4590_v17, %v4205_v13 }
 0x198   : > { %v1919_v34 = vpop.f32.mrf.mxu2  ;;  %v1584_v38 = vpop.f32.mrf.mxu0 }
 0x199   : > { %v2088_v37 = vpop.f32.mrf.mxu3  ;;  %v1753_v52 = vpop.f32.mrf.mxu1  ;;  %5767 = vst [vmem:[#allocation13_spill] sm:$0xff] %v5358_v23 }
 0x19a   : > { %v2089_v45 = vadd.f32 %v2088_v37, %v1919_v34  ;;  %v1754_v2 = vadd.f32 %v1753_v52, %v1584_v38  ;;  %v5360_v38 = vor.u32 %v4589_v22, %v4207_v29 }
 0x19b   : > { %1623 = vmatmul.bf16.gmra.mxu0 %v5348_v36 }
 0x19c   : > { %v3683_v63 = vpack.c.bf16 %v2089_v45, %v1751_v41  ;;  %1792 = vmatmul.bf16.gmra.mxu1 %v5350_v39  ;;  %5768 = vst [vmem:[#allocation14_spill] sm:$0xff] %v5360_v38 }
 0x19d   : > { %1961 = vmatmul.bf16.gmra.mxu2 %v5348_v36 }
 0x19e   : > { %3811 = vst [vmem:[%s5201_s19 + $0x190] sm:$0xff] %v3683_v63  ;;  %2130 = vmatmul.bf16.gmra.mxu3 %v5350_v39 }
 0x1a0   : > { %v1922_v4 = vpop.f32.mrf.mxu2  ;;  %v1586_v8 = vpop.f32.mrf.mxu0 }
 0x1a1   : > { %v2091_v7 = vpop.f32.mrf.mxu3  ;;  %v1755_v12 = vpop.f32.mrf.mxu1 }
 0x1a2   : > { %v2092_v10 = vadd.f32 %v2091_v7, %v1922_v4  ;;  %v1756_v41 = vadd.f32 %v1755_v12, %v1586_v8  ;;  %v4311_v4 = vld [vmem:[%s5034_s7 + $0x38] sm:$0xf0] }
 0x1a4   : > { %v3685_v11 = vpack.c.bf16 %v2092_v10, %v1754_v2  ;;  %v4614_v2 = vld [vmem:[%s5034_s7 + $0x2c] sm:$0xf] }
 0x1a5   : > { %v4314_v7 = vor.u32 %v4614_v2, %v4311_v4  ;;  %v4646_v10 = vld [vmem:[%s5034_s7 + $0x12c] sm:$0xf]  ;;  %v4215_v2 = vld [vmem:[#allocation3 + $0x178] sm:$0xf0]  ;;  %v4309_v4 = vld [vmem:[%s5034_s7 + $0x28] sm:$0xf] }
 0x1a6   : > { %3813 = vst [vmem:[%s5201_s19 + $0x1a0] sm:$0xff] %v3685_v11  ;;  %v4439_v11 = vld [vmem:[%s5034_s7 + $0x138] sm:$0xf0] }
 0x1a7   : > { %v4442_v13 = vor.u32 %v4646_v10, %v4439_v11  ;;  %2530 = vmatpush.bf16.msrb.mxu2 %v4314_v7 }
 0x1a8   : > { %v1924_v18 = vpop.f32.mrf.mxu2  ;;  %v1589_v37 = vpop.f32.mrf.mxu0 }
 0x1a9   : > { %v2093_v34 = vpop.f32.mrf.mxu3  ;;  %v1758_v52 = vpop.f32.mrf.mxu1  ;;  %2699 = vmatpush.bf16.msrb.mxu3 %v4442_v13 }
 0x1aa   : > { %v2094_v45 = vadd.f32 %v2093_v34, %v1924_v18  ;;  %v1759_v8 = vadd.f32 %v1758_v52, %v1589_v37  ;;  %v4437_v52 = vld [vmem:[%s5034_s7 + $0x128] sm:$0xf] }
 0x1ab   : > { %1628 = vmatmul.bf16.gmra.mxu0 %v5358_v23 }
 0x1ac   : > { %v3687_v63 = vpack.c.bf16 %v2094_v45, %v1756_v41  ;;  %1797 = vmatmul.bf16.gmra.mxu1 %v5360_v38  ;;  %v4213_v41 = vld [vmem:[#allocation3 + $0x170] sm:$0xf]  ;;  %v4592_v45 = vld [vmem:[#allocation3 + $0x174] sm:$0xf0] }
 0x1ad   : > { %1966 = vmatmul.bf16.gmra.mxu2 %v5358_v23  ;;  %v4648_v23 = vld [vmem:[%s5034_s7 + $0x134] sm:$0xf0]  ;;  %v5376_v11 = vor.u32 %v4592_v45, %v4213_v41 }
 0x1ae   : > { %3815 = vst [vmem:[%s5201_s19 + $0x1b0] sm:$0xff] %v3687_v63  ;;  %2135 = vmatmul.bf16.gmra.mxu3 %v5360_v38  ;;  %v4591_v63 = vld [vmem:[#allocation3 + $0x174] sm:$0xf]  ;;  %v4616_v38 = vld [vmem:[%s5034_s7 + $0x34] sm:$0xf0]  ;;  %v4438_v39 = vor.u32 %v4648_v23, %v4437_v52 }
 0x1af   : > { %v4310_v37 = vor.u32 %v4616_v38, %v4309_v4  ;;  %5769 = vst [vmem:[#allocation15_spill] sm:$0xff] %v5376_v11  ;;  %v4593_v4 = vld [vmem:[#allocation3 + $0x184] sm:$0xf] }
 0x1b0   : > { %v1927_v12 = vpop.f32.mrf.mxu2  ;;  %v1591_v22 = vpop.f32.mrf.mxu0  ;;  %2361 = vmatpush.bf16.msrb.mxu1 %v4438_v39  ;;  %v4594_v39 = vld [vmem:[#allocation3 + $0x184] sm:$0xf0] }
 0x1b1   : > { %v2096_v17 = vpop.f32.mrf.mxu3  ;;  %v1760_v18 = vpop.f32.mrf.mxu1  ;;  %2192 = vmatpush.bf16.msrb.mxu0 %v4310_v37  ;;  %v4223_v37 = vld [vmem:[#allocation3 + $0x188] sm:$0xf0] }
 0x1b2   : > { %v2097_v29 = vadd.f32 %v2096_v17, %v1927_v12  ;;  %v5378_v17 = vor.u32 %v4591_v63, %v4215_v2  ;;  %v4221_v2 = vld [vmem:[#allocation3 + $0x180] sm:$0xf] }
 0x1b4   : > { %v3689_v34 = vpack.c.bf16 %v2097_v29, %v1759_v8  ;;  %5770 = vst [vmem:[#allocation16_spill] sm:$0xff] %v5378_v17  ;;  %v1761_v8 = vadd.f32 %v1760_v18, %v1591_v22 }
 0x1b6   : > { %3817 = vst [vmem:[%s5201_s19 + $0x1c0] sm:$0xff] %v3689_v34 }
 0x1b8   : > { %v1929_v10 = vpop.f32.mrf.mxu2  ;;  %v1594_v12 = vpop.f32.mrf.mxu0 }
 0x1b9   : > { %v2098_v7 = vpop.f32.mrf.mxu3  ;;  %v1763_v29 = vpop.f32.mrf.mxu1 }
 0x1ba   : > { %v2099_v13 = vadd.f32 %v2098_v7, %v1929_v10  ;;  %v1764_v23 = vadd.f32 %v1763_v29, %v1594_v12  ;;  %v5386_v10 = vor.u32 %v4594_v39, %v4221_v2 }
 0x1bb   : > { %1633 = vmatmul.bf16.gmra.mxu0 %v5376_v11 }
 0x1bc   : > { %v3691_v34 = vpack.c.bf16 %v2099_v13, %v1761_v8  ;;  %1802 = vmatmul.bf16.gmra.mxu1 %v5378_v17  ;;  %5771 = vst [vmem:[#allocation17_spill] sm:$0xff] %v5386_v10  ;;  %v5388_v13 = vor.u32 %v4593_v4, %v4223_v37  ;;  %v4596_v4 = vld [vmem:[#allocation3 + $0x194] sm:$0xf0]  ;;  %v4595_v37 = vld [vmem:[#allocation3 + $0x194] sm:$0xf] }
 0x1bd   : > { %1971 = vmatmul.bf16.gmra.mxu2 %v5376_v11 }
 0x1be   : > { %3819 = vst [vmem:[%s5201_s19 + $0x1d0] sm:$0xff] %v3691_v34  ;;  %2140 = vmatmul.bf16.gmra.mxu3 %v5378_v17  ;;  %v4644_v17 = vld [vmem:[%s5034_s7 + $0x114] sm:$0xf0] }
 0x1bf   : > { %5772 = vst [vmem:[#allocation18_spill] sm:$0xff] %v5388_v13 }
 0x1c0   : > { %v1932_v38 = vpop.f32.mrf.mxu2  ;;  %v1596_v45 = vpop.f32.mrf.mxu0 }
 0x1c1   : > { %v2101_v41 = vpop.f32.mrf.mxu3  ;;  %v1765_v22 = vpop.f32.mrf.mxu1 }
 0x1c2   : > { %v2102_v63 = vadd.f32 %v2101_v41, %v1932_v38  ;;  %v1766_v12 = vadd.f32 %v1765_v22, %v1596_v45  ;;  %v4229_v22 = vld [vmem:[#allocation3 + $0x190] sm:$0xf] }
 0x1c4   : > { %v3693_v18 = vpack.c.bf16 %v2102_v63, %v1764_v23 }
 0x1c6   : > { %3821 = vst [vmem:[%s5201_s19 + $0x1e0] sm:$0xff] %v3693_v18 }
 0x1c8   : > { %v1934_v52 = vpop.f32.mrf.mxu2  ;;  %v1599_v8 = vpop.f32.mrf.mxu0 }
 0x1c9   : > { %v2103_v7 = vpop.f32.mrf.mxu3  ;;  %v1768_v34 = vpop.f32.mrf.mxu1 }
 0x1ca   : > { %v2104_v29 = vadd.f32 %v2103_v7, %v1934_v52  ;;  %v1769_v23 = vadd.f32 %v1768_v34, %v1599_v8  ;;  %v4231_v52 = vld [vmem:[#allocation3 + $0x198] sm:$0xf0] }
 0x1cb   : > { %1638 = vmatmul.bf16.gmra.mxu0 %v5386_v10 }
 0x1cc   : > { %v3695_v38 = vpack.c.bf16 %v2104_v29, %v1766_v12  ;;  %1807 = vmatmul.bf16.gmra.mxu1 %v5388_v13  ;;  %v5396_v12 = vor.u32 %v4596_v4, %v4229_v22 }
 0x1cd   : > { %1976 = vmatmul.bf16.gmra.mxu2 %v5386_v10  ;;  %v5398_v10 = vor.u32 %v4595_v37, %v4231_v52  ;;  %v4598_v37 = vld [vmem:[#allocation3 + $0x1a4] sm:$0xf0]  ;;  %v4597_v52 = vld [vmem:[#allocation3 + $0x1a4] sm:$0xf] }
 0x1ce   : > { %3823 = vst [vmem:[%s5201_s19 + $0x1f0] sm:$0xff] %v3695_v38  ;;  %2145 = vmatmul.bf16.gmra.mxu3 %v5388_v13 }
 0x1cf   : > { %5773 = vst [vmem:[#allocation19_spill] sm:$0xff] %v5396_v12 }
 0x1d0   : > { %v1937_v41 = vpop.f32.mrf.mxu2  ;;  %v1601_v18 = vpop.f32.mrf.mxu0  ;;  %5774 = vst [vmem:[#allocation20_spill] sm:$0xff] %v5398_v10 }
 0x1d1   : > { %v2106_v63 = vpop.f32.mrf.mxu3  ;;  %v1770_v39 = vpop.f32.mrf.mxu1 }
 0x1d2   : > { %v2107_v2 = vadd.f32 %v2106_v63, %v1937_v41  ;;  %v1771_v8 = vadd.f32 %v1770_v39, %v1601_v18  ;;  %v4237_v39 = vld [vmem:[#allocation3 + $0x1a0] sm:$0xf] }
 0x1d4   : > { %v3697_v45 = vpack.c.bf16 %v2107_v2, %v1769_v23 }
 0x1d6   : > { %3825 = vst [vmem:[%s5201_s19 + $0x200] sm:$0xff] %v3697_v45 }
 0x1d8   : > { %v1939_v7 = vpop.f32.mrf.mxu2  ;;  %v1604_v38 = vpop.f32.mrf.mxu0 }
 0x1d9   : > { %v2108_v29 = vpop.f32.mrf.mxu3  ;;  %v1773_v13 = vpop.f32.mrf.mxu1 }
 0x1da   : > { %v2109_v34 = vadd.f32 %v2108_v29, %v1939_v7  ;;  %v1774_v23 = vadd.f32 %v1773_v13, %v1604_v38  ;;  %v4239_v7 = vld [vmem:[#allocation3 + $0x1a8] sm:$0xf0] }
 0x1db   : > { %1643 = vmatmul.bf16.gmra.mxu0 %v5396_v12  ;;  %v5408_v38 = vor.u32 %v4597_v52, %v4239_v7  ;;  %v4423_v52 = vld [vmem:[%s5034_s7 + $0x118] sm:$0xf0] }
 0x1dc   : > { %v3699_v41 = vpack.c.bf16 %v2109_v34, %v1771_v8  ;;  %1812 = vmatmul.bf16.gmra.mxu1 %v5398_v10  ;;  %v5406_v8 = vor.u32 %v4598_v37, %v4237_v39  ;;  %v4642_v37 = vld [vmem:[%s5034_s7 + $0x10c] sm:$0xf] }
 0x1dd   : > { %1981 = vmatmul.bf16.gmra.mxu2 %v5396_v12  ;;  %5776 = vst [vmem:[#allocation22_spill] sm:$0xff] %v5408_v38  ;;  %v4426_v7 = vor.u32 %v4642_v37, %v4423_v52  ;;  %v4612_v12 = vld [vmem:[%s5034_s7 + $0x14] sm:$0xf0] }
 0x1de   : > { %3827 = vst [vmem:[%s5201_s19 + $0x210] sm:$0xff] %v3699_v41  ;;  %2150 = vmatmul.bf16.gmra.mxu3 %v5398_v10  ;;  %v4293_v10 = vld [vmem:[%s5034_s7 + $0x8] sm:$0xf] }
 0x1df   : > { %5775 = vst [vmem:[#allocation21_spill] sm:$0xff] %v5406_v8  ;;  %2700 = vmatpush.bf16.msrb.mxu3 %v4426_v7 }
 0x1e0   : > { %v1942_v63 = vpop.f32.mrf.mxu2  ;;  %v1606_v45 = vpop.f32.mrf.mxu0 }
 0x1e1   : > { %v2111_v2 = vpop.f32.mrf.mxu3  ;;  %v1775_v4 = vpop.f32.mrf.mxu1 }
 0x1e2   : > { %v2112_v22 = vadd.f32 %v2111_v2, %v1942_v63  ;;  %v1776_v41 = vadd.f32 %v1775_v4, %v1606_v45 }
 0x1e4   : > { %v3701_v18 = vpack.c.bf16 %v2112_v22, %v1774_v23  ;;  %v4610_v22 = vld [vmem:[%s5034_s7 + $0xc] sm:$0xf] }
 0x1e6   : > { %3829 = vst [vmem:[%s5201_s19 + $0x220] sm:$0xff] %v3701_v18  ;;  %v4295_v18 = vld [vmem:[%s5034_s7 + $0x18] sm:$0xf0] }
 0x1e7   : > { %v4298_v39 = vor.u32 %v4610_v22, %v4295_v18  ;;  %v4599_v22 = vld [vmem:[#allocation3 + $0x1b4] sm:$0xf]  ;;  %v4247_v18 = vld [vmem:[#allocation3 + $0x1b8] sm:$0xf0] }
 0x1e8   : > { %v1944_v29 = vpop.f32.mrf.mxu2  ;;  %v1609_v13 = vpop.f32.mrf.mxu0 }
 0x1e9   : > { %v2113_v34 = vpop.f32.mrf.mxu3  ;;  %v1778_v23 = vpop.f32.mrf.mxu1  ;;  %2531 = vmatpush.bf16.msrb.mxu2 %v4298_v39 }
 0x1ea   : > { %v2114_v63 = vadd.f32 %v2113_v34, %v1944_v29  ;;  %v1779_v45 = vadd.f32 %v1778_v23, %v1609_v13  ;;  %v4294_v13 = vor.u32 %v4612_v12, %v4293_v10  ;;  %v4421_v23 = vld [vmem:[%s5034_s7 + $0x108] sm:$0xf] }
 0x1eb   : > { %1648 = vmatmul.bf16.gmra.mxu0 %v5406_v8  ;;  %v4422_v11 = vor.u32 %v4644_v17, %v4421_v23 }
 0x1ec   : > { %v3703_v2 = vpack.c.bf16 %v2114_v63, %v1776_v41  ;;  %1817 = vmatmul.bf16.gmra.mxu1 %v5408_v38  ;;  %2193 = vmatpush.bf16.msrb.mxu0 %v4294_v13  ;;  %v4255_v13 = vld [vmem:[#allocation3 + $0x1c8] sm:$0xf0] }
 0x1ed   : > { %1986 = vmatmul.bf16.gmra.mxu2 %v5406_v8  ;;  %v4600_v8 = vld [vmem:[#allocation3 + $0x1b4] sm:$0xf0]  ;;  %2362 = vmatpush.bf16.msrb.mxu1 %v4422_v11  ;;  %v4602_v11 = vld [vmem:[#allocation3 + $0x1c4] sm:$0xf0] }
 0x1ee   : > { %3831 = vst [vmem:[%s5201_s19 + $0x230] sm:$0xff] %v3703_v2  ;;  %2155 = vmatmul.bf16.gmra.mxu3 %v5408_v38  ;;  %v4245_v38 = vld [vmem:[#allocation3 + $0x1b0] sm:$0xf] }
 0x1ef   : > { %v5424_v52 = vor.u32 %v4600_v8, %v4245_v38 }
 0x1f0   : > { %v1947_v4 = vpop.f32.mrf.mxu2  ;;  %v1611_v34 = vpop.f32.mrf.mxu0 }
 0x1f1   : > { %v2116_v29 = vpop.f32.mrf.mxu3  ;;  %v1780_v63 = vpop.f32.mrf.mxu1 }
 0x1f2   : > { %v2117_v41 = vadd.f32 %v2116_v29, %v1947_v4  ;;  %v5426_v29 = vor.u32 %v4599_v22, %v4247_v18  ;;  %v4253_v22 = vld [vmem:[#allocation3 + $0x1c0] sm:$0xf]  ;;  %v4601_v18 = vld [vmem:[#allocation3 + $0x1c4] sm:$0xf] }
 0x1f4   : > { %v3705_v2 = vpack.c.bf16 %v2117_v41, %v1779_v45  ;;  %v1781_v45 = vadd.f32 %v1780_v63, %v1611_v34 }
 0x1f6   : > { %3833 = vst [vmem:[%s5201_s19 + $0x240] sm:$0xff] %v3705_v2 }
 0x1f8   : > { %v1949_v37 = vpop.f32.mrf.mxu2  ;;  %v1614_v4 = vpop.f32.mrf.mxu0 }
 0x1f9   : > { %v2118_v39 = vpop.f32.mrf.mxu3  ;;  %v1783_v41 = vpop.f32.mrf.mxu1 }
 0x1fa   : > { %v2119_v7 = vadd.f32 %v2118_v39, %v1949_v37  ;;  %v1784_v17 = vadd.f32 %v1783_v41, %v1614_v4  ;;  %v5434_v37 = vor.u32 %v4602_v11, %v4253_v22 }
 0x1fb   : > { %1653 = vmatmul.bf16.gmra.mxu0 %v5424_v52 }
 0x1fc   : > { %v3707_v2 = vpack.c.bf16 %v2119_v7, %v1781_v45  ;;  %1822 = vmatmul.bf16.gmra.mxu1 %v5426_v29  ;;  %5777 = vst [vmem:[#allocation23_spill] sm:$0xff] %v5434_v37  ;;  %v5436_v7 = vor.u32 %v4601_v18, %v4255_v13  ;;  %v4604_v18 = vld [vmem:[#allocation3 + $0x1d4] sm:$0xf0]  ;;  %v4603_v13 = vld [vmem:[#allocation3 + $0x1d4] sm:$0xf] }
 0x1fd   : > { %1991 = vmatmul.bf16.gmra.mxu2 %v5424_v52 }
 0x1fe   : > { %3835 = vst [vmem:[%s5201_s19 + $0x250] sm:$0xff] %v3707_v2  ;;  %2160 = vmatmul.bf16.gmra.mxu3 %v5426_v29 }
 0x1ff   : > { %5778 = vst [vmem:[#allocation24_spill] sm:$0xff] %v5436_v7 }
 0x200   : > { %v1952_v10 = vpop.f32.mrf.mxu2  ;;  %v1616_v8 = vpop.f32.mrf.mxu0 }
 0x201   : > { %v2121_v12 = vpop.f32.mrf.mxu3  ;;  %v1785_v34 = vpop.f32.mrf.mxu1 }
 0x202   : > { %v2122_v38 = vadd.f32 %v2121_v12, %v1952_v10  ;;  %v1786_v4 = vadd.f32 %v1785_v34, %v1616_v8  ;;  %v4261_v34 = vld [vmem:[#allocation3 + $0x1d0] sm:$0xf] }
 0x204   : > { %v3709_v63 = vpack.c.bf16 %v2122_v38, %v1784_v17 }
 0x206   : > { %3837 = vst [vmem:[%s5201_s19 + $0x260] sm:$0xff] %v3709_v63 }
 0x208   : > { %v1954_v23 = vpop.f32.mrf.mxu2  ;;  %v1619_v45 = vpop.f32.mrf.mxu0 }
 0x209   : > { %v2123_v39 = vpop.f32.mrf.mxu3  ;;  %v1788_v2 = vpop.f32.mrf.mxu1 }
 0x20a   : > { %v2124_v41 = vadd.f32 %v2123_v39, %v1954_v23  ;;  %v1789_v17 = vadd.f32 %v1788_v2, %v1619_v45  ;;  %v4263_v23 = vld [vmem:[#allocation3 + $0x1d8] sm:$0xf0] }
 0x20b   : > { %1658 = vmatmul.bf16.gmra.mxu0 %v5434_v37 }
 0x20c   : > { %v3711_v10 = vpack.c.bf16 %v2124_v41, %v1786_v4  ;;  %1827 = vmatmul.bf16.gmra.mxu1 %v5436_v7  ;;  %v5444_v4 = vor.u32 %v4604_v18, %v4261_v34 }
 0x20d   : > { %1996 = vmatmul.bf16.gmra.mxu2 %v5434_v37  ;;  %v5446_v37 = vor.u32 %v4603_v13, %v4263_v23  ;;  %v4606_v13 = vld [vmem:[#allocation3 + $0x1e4] sm:$0xf0]  ;;  %v4605_v23 = vld [vmem:[#allocation3 + $0x1e4] sm:$0xf] }
 0x20e   : > { %3839 = vst [vmem:[%s5201_s19 + $0x270] sm:$0xff] %v3711_v10  ;;  %2165 = vmatmul.bf16.gmra.mxu3 %v5436_v7 }
 0x20f   : > { %5779 = vst [vmem:[#allocation25_spill] sm:$0xff] %v5444_v4 }
 0x210   : > { %v1957_v12 = vpop.f32.mrf.mxu2  ;;  %v1621_v63 = vpop.f32.mrf.mxu0  ;;  %5780 = vst [vmem:[#allocation26_spill] sm:$0xff] %v5446_v37 }
 0x211   : > { %v2126_v38 = vpop.f32.mrf.mxu3  ;;  %v1790_v11 = vpop.f32.mrf.mxu1 }
 0x212   : > { %v2127_v22 = vadd.f32 %v2126_v38, %v1957_v12  ;;  %v1791_v45 = vadd.f32 %v1790_v11, %v1621_v63  ;;  %v4269_v11 = vld [vmem:[#allocation3 + $0x1e0] sm:$0xf] }
 0x214   : > { %v3713_v8 = vpack.c.bf16 %v2127_v22, %v1789_v17 }
 0x216   : > { %3841 = vst [vmem:[%s5201_s19 + $0x280] sm:$0xff] %v3713_v8 }
 0x218   : > { %v1959_v39 = vpop.f32.mrf.mxu2  ;;  %v1624_v10 = vpop.f32.mrf.mxu0 }
 0x219   : > { %v2128_v41 = vpop.f32.mrf.mxu3  ;;  %v1793_v7 = vpop.f32.mrf.mxu1 }
 0x21a   : > { %v2129_v2 = vadd.f32 %v2128_v41, %v1959_v39  ;;  %v1794_v17 = vadd.f32 %v1793_v7, %v1624_v10  ;;  %v4271_v39 = vld [vmem:[#allocation3 + $0x1e8] sm:$0xf0] }
 0x21b   : > { %1663 = vmatmul.bf16.gmra.mxu0 %v5444_v4 }
 0x21c   : > { %v3715_v12 = vpack.c.bf16 %v2129_v2, %v1791_v45  ;;  %1832 = vmatmul.bf16.gmra.mxu1 %v5446_v37  ;;  %v5454_v45 = vor.u32 %v4606_v13, %v4269_v11 }
 0x21d   : > { %2001 = vmatmul.bf16.gmra.mxu2 %v5444_v4  ;;  %v5456_v4 = vor.u32 %v4605_v23, %v4271_v39  ;;  %v4608_v23 = vld [vmem:[#allocation3 + $0x1f4] sm:$0xf0]  ;;  %v4607_v39 = vld [vmem:[#allocation3 + $0x1f4] sm:$0xf] }
 0x21e   : > { %3843 = vst [vmem:[%s5201_s19 + $0x290] sm:$0xff] %v3715_v12  ;;  %2170 = vmatmul.bf16.gmra.mxu3 %v5446_v37 }
 0x21f   : > { %5781 = vst [vmem:[#allocation27_spill] sm:$0xff] %v5454_v45 }
 0x220   : > { %v1962_v38 = vpop.f32.mrf.mxu2  ;;  %v1626_v8 = vpop.f32.mrf.mxu0  ;;  %5782 = vst [vmem:[#allocation28_spill] sm:$0xff] %v5456_v4 }
 0x221   : > { %v2131_v22 = vpop.f32.mrf.mxu3  ;;  %v1795_v18 = vpop.f32.mrf.mxu1 }
 0x222   : > { %v2132_v34 = vadd.f32 %v2131_v22, %v1962_v38  ;;  %v1796_v7 = vadd.f32 %v1795_v18, %v1626_v8  ;;  %v4277_v18 = vld [vmem:[#allocation3 + $0x1f0] sm:$0xf] }
 0x224   : > { %v3717_v63 = vpack.c.bf16 %v2132_v34, %v1794_v17 }
 0x226   : > { %3845 = vst [vmem:[%s5201_s19 + $0x2a0] sm:$0xff] %v3717_v63 }
 0x228   : > { %v1964_v41 = vpop.f32.mrf.mxu2  ;;  %v1629_v12 = vpop.f32.mrf.mxu0 }
 0x229   : > { %v2133_v2 = vpop.f32.mrf.mxu3  ;;  %v1798_v37 = vpop.f32.mrf.mxu1 }
 0x22a   : > { %v2134_v10 = vadd.f32 %v2133_v2, %v1964_v41  ;;  %v1799_v17 = vadd.f32 %v1798_v37, %v1629_v12  ;;  %v4279_v41 = vld [vmem:[#allocation3 + $0x1f8] sm:$0xf0] }
 0x22b   : > { %1668 = vmatmul.bf16.gmra.mxu0 %v5454_v45 }
 0x22c   : > { %v3719_v38 = vpack.c.bf16 %v2134_v10, %v1796_v7  ;;  %1837 = vmatmul.bf16.gmra.mxu1 %v5456_v4  ;;  %v5464_v7 = vor.u32 %v4608_v23, %v4277_v18 }
 0x22d   : > { %2006 = vmatmul.bf16.gmra.mxu2 %v5454_v45  ;;  %v5466_v45 = vor.u32 %v4607_v39, %v4279_v41 }
 0x22e   : > { %3847 = vst [vmem:[%s5201_s19 + $0x2b0] sm:$0xff] %v3719_v38  ;;  %2175 = vmatmul.bf16.gmra.mxu3 %v5456_v4 }
 0x230   : > { %v1967_v22 = vpop.f32.mrf.mxu2  ;;  %v1631_v63 = vpop.f32.mrf.mxu0 }
 0x231   : > { %v2136_v34 = vpop.f32.mrf.mxu3  ;;  %v1800_v13 = vpop.f32.mrf.mxu1 }
 0x232   : > { %v2137_v11 = vadd.f32 %v2136_v34, %v1967_v22  ;;  %v1801_v37 = vadd.f32 %v1800_v13, %v1631_v63 }
 0x234   : > { %v3721_v8 = vpack.c.bf16 %v2137_v11, %v1799_v17 }
 0x236   : > { %3849 = vst [vmem:[%s5201_s19 + $0x2c0] sm:$0xff] %v3721_v8 }
 0x238   : > { %v1969_v2 = vpop.f32.mrf.mxu2  ;;  %v1634_v38 = vpop.f32.mrf.mxu0 }
 0x239   : > { %v2138_v10 = vpop.f32.mrf.mxu3  ;;  %v1803_v4 = vpop.f32.mrf.mxu1 }
 0x23a   : > { %v2139_v12 = vadd.f32 %v2138_v10, %v1969_v2  ;;  %v1804_v17 = vadd.f32 %v1803_v4, %v1634_v38 }
 0x23b   : > { %1673 = vmatmul.bf16.gmra.mxu0 %v5464_v7 }
 0x23c   : > { %v3723_v22 = vpack.c.bf16 %v2139_v12, %v1801_v37  ;;  %1842 = vmatmul.bf16.gmra.mxu1 %v5466_v45 }
 0x23d   : > { %2011 = vmatmul.bf16.gmra.mxu2 %v5464_v7 }
 0x23e   : > { %3851 = vst [vmem:[%s5201_s19 + $0x2d0] sm:$0xff] %v3723_v22  ;;  %2180 = vmatmul.bf16.gmra.mxu3 %v5466_v45 }
 0x240   : > { %v1972_v34 = vpop.f32.mrf.mxu2  ;;  %v1636_v8 = vpop.f32.mrf.mxu0 }
 0x241   : > { %v2141_v11 = vpop.f32.mrf.mxu3  ;;  %v1805_v63 = vpop.f32.mrf.mxu1 }
 0x242   : > { %v2142_v18 = vadd.f32 %v2141_v11, %v1972_v34  ;;  %v1806_v2 = vadd.f32 %v1805_v63, %v1636_v8 }
 0x244   : > { %v3725_v13 = vpack.c.bf16 %v2142_v18, %v1804_v17 }
 0x246   : > { %3853 = vst [vmem:[%s5201_s19 + $0x2e0] sm:$0xff] %v3725_v13 }
 0x248   : > { %v1974_v23 = vpop.f32.mrf.mxu2  ;;  %v1639_v41 = vpop.f32.mrf.mxu0 }
 0x249   : > { %v2143_v39 = vpop.f32.mrf.mxu3  ;;  %v1808_v37 = vpop.f32.mrf.mxu1 }
 0x24a   : > { %v2144_v10 = vadd.f32 %v2143_v39, %v1974_v23  ;;  %v1809_v4 = vadd.f32 %v1808_v37, %v1639_v41 }
 0x24b   : > { %2194 = vmatmul.bf16.vlgmr.msrb.gmra.mxu0 %v5110_v43 }
 0x24c   : > { %v3727_v12 = vpack.c.bf16 %v2144_v10, %v1806_v2  ;;  %2363 = vmatmul.bf16.vlgmr.msrb.gmra.mxu1 %v5114_v47 }
 0x24d   : > { %2532 = vmatmul.bf16.vlgmr.msrb.gmra.mxu2 %v5110_v43 }
 0x24e   : > { %3855 = vst [vmem:[%s5201_s19 + $0x2f0] sm:$0xff] %v3727_v12  ;;  %2701 = vmatmul.bf16.vlgmr.msrb.gmra.mxu3 %v5114_v47 }
 0x250   : > { %v1977_v38 = vpop.f32.mrf.mxu2  ;;  %v1641_v17 = vpop.f32.mrf.mxu0 }
 0x251   : > { %v2146_v22 = vpop.f32.mrf.mxu3  ;;  %v1810_v11 = vpop.f32.mrf.mxu1 }
 0x252   : > { %v2147_v34 = vadd.f32 %v2146_v22, %v1977_v38  ;;  %v1811_v23 = vadd.f32 %v1810_v11, %v1641_v17 }
 0x254   : > { %v3729_v8 = vpack.c.bf16 %v2147_v34, %v1809_v4 }
 0x256   : > { %3857 = vst [vmem:[%s5201_s19 + $0x300] sm:$0xff] %v3729_v8 }
 0x258   : > { %v1979_v18 = vpop.f32.mrf.mxu2  ;;  %v1644_v13 = vpop.f32.mrf.mxu0 }
 0x259   : > { %v2148_v63 = vpop.f32.mrf.mxu3  ;;  %v1813_v2 = vpop.f32.mrf.mxu1 }
 0x25a   : > { %v2149_v39 = vadd.f32 %v2148_v63, %v1979_v18  ;;  %v1814_v47 = vadd.f32 %v1813_v2, %v1644_v13 }
 0x25b   : > { %2199 = vmatmul.bf16.gmra.mxu0 %v5120_v54 }
 0x25c   : > { %v3731_v43 = vpack.c.bf16 %v2149_v39, %v1811_v23  ;;  %2368 = vmatmul.bf16.gmra.mxu1 %v5122_v55 }
 0x25d   : > { %2537 = vmatmul.bf16.gmra.mxu2 %v5120_v54 }
 0x25e   : > { %3859 = vst [vmem:[%s5201_s19 + $0x310] sm:$0xff] %v3731_v43  ;;  %2706 = vmatmul.bf16.gmra.mxu3 %v5122_v55 }
 0x260   : > { %v1982_v41 = vpop.f32.mrf.mxu2  ;;  %v1646_v37 = vpop.f32.mrf.mxu0 }
 0x261   : > { %v2151_v10 = vpop.f32.mrf.mxu3  ;;  %v1815_v4 = vpop.f32.mrf.mxu1 }
 0x262   : > { %v2152_v12 = vadd.f32 %v2151_v10, %v1982_v41  ;;  %v1816_v11 = vadd.f32 %v1815_v4, %v1646_v37 }
 0x264   : > { %v3733_v38 = vpack.c.bf16 %v2152_v12, %v1814_v47 }
 0x266   : > { %3861 = vst [vmem:[%s5201_s19 + $0x320] sm:$0xff] %v3733_v38 }
 0x268   : > { %v1984_v22 = vpop.f32.mrf.mxu2  ;;  %v1649_v34 = vpop.f32.mrf.mxu0 }
 0x269   : > { %v2153_v17 = vpop.f32.mrf.mxu3  ;;  %v1818_v18 = vpop.f32.mrf.mxu1 }
 0x26a   : > { %v2154_v8 = vadd.f32 %v2153_v17, %v1984_v22  ;;  %v1819_v55 = vadd.f32 %v1818_v18, %v1649_v34 }
 0x26b   : > { %2204 = vmatmul.bf16.gmra.mxu0 %v5128_v60 }
 0x26c   : > { %v3735_v54 = vpack.c.bf16 %v2154_v8, %v1816_v11  ;;  %2373 = vmatmul.bf16.gmra.mxu1 %v5130_v61 }
 0x26d   : > { %2542 = vmatmul.bf16.gmra.mxu2 %v5128_v60 }
 0x26e   : > { %3863 = vst [vmem:[%s5201_s19 + $0x330] sm:$0xff] %v3735_v54  ;;  %2711 = vmatmul.bf16.gmra.mxu3 %v5130_v61 }
 0x270   : > { %v1987_v63 = vpop.f32.mrf.mxu2  ;;  %v1651_v23 = vpop.f32.mrf.mxu0 }
 0x271   : > { %v2156_v13 = vpop.f32.mrf.mxu3  ;;  %v1820_v2 = vpop.f32.mrf.mxu1 }
 0x272   : > { %v2157_v39 = vadd.f32 %v2156_v13, %v1987_v63  ;;  %v1821_v37 = vadd.f32 %v1820_v2, %v1651_v23 }
 0x274   : > { %v3737_v43 = vpack.c.bf16 %v2157_v39, %v1819_v55 }
 0x276   : > { %3865 = vst [vmem:[%s5201_s19 + $0x340] sm:$0xff] %v3737_v43 }
 0x278   : > { %v1989_v47 = vpop.f32.mrf.mxu2  ;;  %v1654_v10 = vpop.f32.mrf.mxu0 }
 0x279   : > { %v2158_v41 = vpop.f32.mrf.mxu3  ;;  %v1823_v4 = vpop.f32.mrf.mxu1 }
 0x27a   : > { %v2159_v12 = vadd.f32 %v2158_v41, %v1989_v47  ;;  %v1824_v61 = vadd.f32 %v1823_v4, %v1654_v10 }
 0x27b   : > { %2209 = vmatmul.bf16.gmra.mxu0 %v5144_v14 }
 0x27c   : > { %v3739_v60 = vpack.c.bf16 %v2159_v12, %v1821_v37  ;;  %2378 = vmatmul.bf16.gmra.mxu1 %v5146_v15 }
 0x27d   : > { %2547 = vmatmul.bf16.gmra.mxu2 %v5144_v14 }
 0x27e   : > { %3867 = vst [vmem:[%s5201_s19 + $0x350] sm:$0xff] %v3739_v60  ;;  %2716 = vmatmul.bf16.gmra.mxu3 %v5146_v15 }
 0x280   : > { %v1992_v38 = vpop.f32.mrf.mxu2  ;;  %v1656_v17 = vpop.f32.mrf.mxu0 }
 0x281   : > { %v2161_v22 = vpop.f32.mrf.mxu3  ;;  %v1825_v11 = vpop.f32.mrf.mxu1 }
 0x282   : > { %v2162_v34 = vadd.f32 %v2161_v22, %v1992_v38  ;;  %v1826_v63 = vadd.f32 %v1825_v11, %v1656_v17 }
 0x284   : > { %v3741_v8 = vpack.c.bf16 %v2162_v34, %v1824_v61 }
 0x286   : > { %3869 = vst [vmem:[%s5201_s19 + $0x360] sm:$0xff] %v3741_v8 }
 0x288   : > { %v1994_v18 = vpop.f32.mrf.mxu2  ;;  %v1659_v55 = vpop.f32.mrf.mxu0 }
 0x289   : > { %v2163_v54 = vpop.f32.mrf.mxu3  ;;  %v1828_v23 = vpop.f32.mrf.mxu1 }
 0x28a   : > { %v2164_v13 = vadd.f32 %v2163_v54, %v1994_v18  ;;  %v1829_v15 = vadd.f32 %v1828_v23, %v1659_v55 }
 0x28b   : > { %2214 = vmatmul.bf16.gmra.mxu0 %v5152_v20 }
 0x28c   : > { %v3743_v14 = vpack.c.bf16 %v2164_v13, %v1826_v63  ;;  %2383 = vmatmul.bf16.gmra.mxu1 %v5154_v21 }
 0x28d   : > { %2552 = vmatmul.bf16.gmra.mxu2 %v5152_v20 }
 0x28e   : > { %3871 = vst [vmem:[%s5201_s19 + $0x370] sm:$0xff] %v3743_v14  ;;  %2721 = vmatmul.bf16.gmra.mxu3 %v5154_v21 }
 0x290   : > { %v1997_v39 = vpop.f32.mrf.mxu2  ;;  %v1661_v43 = vpop.f32.mrf.mxu0 }
 0x291   : > { %v2166_v2 = vpop.f32.mrf.mxu3  ;;  %v1830_v41 = vpop.f32.mrf.mxu1 }
 0x292   : > { %v2167_v47 = vadd.f32 %v2166_v2, %v1997_v39  ;;  %v1831_v60 = vadd.f32 %v1830_v41, %v1661_v43 }
 0x294   : > { %v3745_v10 = vpack.c.bf16 %v2167_v47, %v1829_v15 }
 0x296   : > { %3873 = vst [vmem:[%s5201_s19 + $0x380] sm:$0xff] %v3745_v10 }
 0x298   : > { %v1999_v37 = vpop.f32.mrf.mxu2  ;;  %v1664_v4 = vpop.f32.mrf.mxu0 }
 0x299   : > { %v2168_v12 = vpop.f32.mrf.mxu3  ;;  %v1833_v38 = vpop.f32.mrf.mxu1 }
 0x29a   : > { %v2169_v61 = vadd.f32 %v2168_v12, %v1999_v37  ;;  %v1834_v21 = vadd.f32 %v1833_v38, %v1664_v4 }
 0x29b   : > { %2219 = vmatmul.bf16.gmra.mxu0 %v5160_v26 }
 0x29c   : > { %v3747_v20 = vpack.c.bf16 %v2169_v61, %v1831_v60  ;;  %2388 = vmatmul.bf16.gmra.mxu1 %v5162_v27 }
 0x29d   : > { %2557 = vmatmul.bf16.gmra.mxu2 %v5160_v26 }
 0x29e   : > { %3875 = vst [vmem:[%s5201_s19 + $0x390] sm:$0xff] %v3747_v20  ;;  %2726 = vmatmul.bf16.gmra.mxu3 %v5162_v27 }
 0x2a0   : > { %v2002_v22 = vpop.f32.mrf.mxu2  ;;  %v1666_v34 = vpop.f32.mrf.mxu0 }
 0x2a1   : > { %v2171_v17 = vpop.f32.mrf.mxu3  ;;  %v1835_v8 = vpop.f32.mrf.mxu1 }
 0x2a2   : > { %v2172_v11 = vadd.f32 %v2171_v17, %v2002_v22  ;;  %v1836_v13 = vadd.f32 %v1835_v8, %v1666_v34 }
 0x2a4   : > { %v3749_v18 = vpack.c.bf16 %v2172_v11, %v1834_v21 }
 0x2a6   : > { %3877 = vst [vmem:[%s5201_s19 + $0x3a0] sm:$0xff] %v3749_v18 }
 0x2a8   : > { %v2004_v54 = vpop.f32.mrf.mxu2  ;;  %v1669_v63 = vpop.f32.mrf.mxu0 }
 0x2a9   : > { %v2173_v55 = vpop.f32.mrf.mxu3  ;;  %v1838_v14 = vpop.f32.mrf.mxu1 }
 0x2aa   : > { %v2174_v23 = vadd.f32 %v2173_v55, %v2004_v54  ;;  %v1839_v27 = vadd.f32 %v1838_v14, %v1669_v63 }
 0x2ab   : > { %2224 = vmatmul.bf16.gmra.mxu0 %v5168_v32 }
 0x2ac   : > { %v3751_v26 = vpack.c.bf16 %v2174_v23, %v1836_v13  ;;  %2393 = vmatmul.bf16.gmra.mxu1 %v5170_v33 }
 0x2ad   : > { %2562 = vmatmul.bf16.gmra.mxu2 %v5168_v32 }
 0x2ae   : > { %3879 = vst [vmem:[%s5201_s19 + $0x3b0] sm:$0xff] %v3751_v26  ;;  %2731 = vmatmul.bf16.gmra.mxu3 %v5170_v33 }
 0x2b0   : > { %v2007_v15 = vpop.f32.mrf.mxu2  ;;  %v1671_v2 = vpop.f32.mrf.mxu0 }
 0x2b1   : > { %v2176_v39 = vpop.f32.mrf.mxu3  ;;  %v1840_v47 = vpop.f32.mrf.mxu1 }
 0x2b2   : > { %v2177_v43 = vadd.f32 %v2176_v39, %v2007_v15  ;;  %v1841_v4 = vadd.f32 %v1840_v47, %v1671_v2 }
 0x2b4   : > { %v3753_v41 = vpack.c.bf16 %v2177_v43, %v1839_v27 }
 0x2b6   : > { %3881 = vst [vmem:[%s5201_s19 + $0x3c0] sm:$0xff] %v3753_v41 }
 0x2b8   : > { %v2009_v10 = vpop.f32.mrf.mxu2  ;;  %v1674_v12 = vpop.f32.mrf.mxu0 }
 0x2b9   : > { %v2178_v37 = vpop.f32.mrf.mxu3  ;;  %v1843_v61 = vpop.f32.mrf.mxu1 }
 0x2ba   : > { %v2179_v60 = vadd.f32 %v2178_v37, %v2009_v10  ;;  %v1844_v33 = vadd.f32 %v1843_v61, %v1674_v12 }
 0x2bb   : > { %2229 = vmatmul.bf16.gmra.mxu0 %v5184_v51 }
 0x2bc   : > { %v3755_v32 = vpack.c.bf16 %v2179_v60, %v1841_v4  ;;  %2398 = vmatmul.bf16.gmra.mxu1 %v5186_v53 }
 0x2bd   : > { %2567 = vmatmul.bf16.gmra.mxu2 %v5184_v51 }
 0x2be   : > { %3883 = vst [vmem:[%s5201_s19 + $0x3d0] sm:$0xff] %v3755_v32  ;;  %2736 = vmatmul.bf16.gmra.mxu3 %v5186_v53 }
 0x2c0   : > { %v2012_v38 = vpop.f32.mrf.mxu2  ;;  %v1676_v21 = vpop.f32.mrf.mxu0 }
 0x2c1   : > { %v2181_v20 = vpop.f32.mrf.mxu3  ;;  %v1845_v17 = vpop.f32.mrf.mxu1 }
 0x2c2   : > { %v2182_v22 = vadd.f32 %v2181_v20, %v2012_v38  ;;  %v1846_v54 = vadd.f32 %v1845_v17, %v1676_v21 }
 0x2c4   : > { %v3757_v34 = vpack.c.bf16 %v2182_v22, %v1844_v33 }
 0x2c6   : > { %3885 = vst [vmem:[%s5201_s19 + $0x3e0] sm:$0xff] %v3757_v34 }
 0x2c8   : > { %v2014_v11 = vpop.f32.mrf.mxu2  ;;  %v2195_v18 = vpop.f32.mrf.mxu0 }
 0x2c9   : > { %v2183_v8 = vpop.f32.mrf.mxu3  ;;  %v2364_v63 = vpop.f32.mrf.mxu1 }
 0x2ca   : > { %v2184_v55 = vadd.f32 %v2183_v8, %v2014_v11  ;;  %v2365_v53 = vadd.f32 %v2364_v63, %v2195_v18 }
 0x2cb   : > { %2234 = vmatmul.bf16.gmra.mxu0 %v5192_v62 }
 0x2cc   : > { %v3759_v51 = vpack.c.bf16 %v2184_v55, %v1846_v54  ;;  %2403 = vmatmul.bf16.gmra.mxu1 %v5194_v0 }
 0x2cd   : > { %2572 = vmatmul.bf16.gmra.mxu2 %v5192_v62 }
 0x2ce   : > { %3887 = vst [vmem:[%s5201_s19 + $0x3f0] sm:$0xff] %v3759_v51  ;;  %2741 = vmatmul.bf16.gmra.mxu3 %v5194_v0 }
 0x2d0   : > { %v2533_v13 = vpop.f32.mrf.mxu2  ;;  %v2197_v14 = vpop.f32.mrf.mxu0 }
 0x2d1   : > { %v2702_v23 = vpop.f32.mrf.mxu3  ;;  %v2366_v27 = vpop.f32.mrf.mxu1 }
 0x2d2   : > { %v2703_v26 = vadd.f32 %v2702_v23, %v2533_v13  ;;  %v2367_v47 = vadd.f32 %v2366_v27, %v2197_v14 }
 0x2d4   : > { %v3634_v15 = vpack.c.bf16 %v2703_v26, %v2365_v53 }
 0x2d6   : > { %3762 = vst [vmem:[%s5201_s19 + $0x8] sm:$0xff] %v3634_v15 }
 0x2d8   : > { %v2535_v39 = vpop.f32.mrf.mxu2  ;;  %v2200_v43 = vpop.f32.mrf.mxu0 }
 0x2d9   : > { %v2704_v2 = vpop.f32.mrf.mxu3  ;;  %v2369_v10 = vpop.f32.mrf.mxu1 }
 0x2da   : > { %v2705_v41 = vadd.f32 %v2704_v2, %v2535_v39  ;;  %v2370_v0 = vadd.f32 %v2369_v10, %v2200_v43 }
 0x2db   : > { %2239 = vmatmul.bf16.gmra.mxu0 %v5204_v16 }
 0x2dc   : > { %v3636_v62 = vpack.c.bf16 %v2705_v41, %v2367_v47  ;;  %2408 = vmatmul.bf16.gmra.mxu1 %v5206_v19 }
 0x2dd   : > { %2577 = vmatmul.bf16.gmra.mxu2 %v5204_v16 }
 0x2de   : > { %3764 = vst [vmem:[%s5201_s19 + $0x18] sm:$0xff] %v3636_v62  ;;  %2746 = vmatmul.bf16.gmra.mxu3 %v5206_v19 }
 0x2e0   : > { %v2538_v37 = vpop.f32.mrf.mxu2  ;;  %v2202_v4 = vpop.f32.mrf.mxu0 }
 0x2e1   : > { %v2707_v12 = vpop.f32.mrf.mxu3  ;;  %v2371_v61 = vpop.f32.mrf.mxu1 }
 0x2e2   : > { %v2708_v60 = vadd.f32 %v2707_v12, %v2538_v37  ;;  %v2372_v21 = vadd.f32 %v2371_v61, %v2202_v4 }
 0x2e4   : > { %v3638_v32 = vpack.c.bf16 %v2708_v60, %v2370_v0 }
 0x2e6   : > { %3766 = vst [vmem:[%s5201_s19 + $0x28] sm:$0xff] %v3638_v32 }
 0x2e8   : > { %v2540_v33 = vpop.f32.mrf.mxu2  ;;  %v2205_v20 = vpop.f32.mrf.mxu0 }
 0x2e9   : > { %v2709_v38 = vpop.f32.mrf.mxu3  ;;  %v2374_v17 = vpop.f32.mrf.mxu1 }
 0x2ea   : > { %v2710_v22 = vadd.f32 %v2709_v38, %v2540_v33  ;;  %v2375_v19 = vadd.f32 %v2374_v17, %v2205_v20 }
 0x2eb   : > { %2244 = vmatmul.bf16.gmra.mxu0 %v5214_v42 }
 0x2ec   : > { %v3640_v16 = vpack.c.bf16 %v2710_v22, %v2372_v21  ;;  %2413 = vmatmul.bf16.gmra.mxu1 %v5216_v46 }
 0x2ed   : > { %2582 = vmatmul.bf16.gmra.mxu2 %v5214_v42 }
 0x2ee   : > { %3768 = vst [vmem:[%s5201_s19 + $0x38] sm:$0xff] %v3640_v16  ;;  %2751 = vmatmul.bf16.gmra.mxu3 %v5216_v46 }
 0x2f0   : > { %v2543_v34 = vpop.f32.mrf.mxu2  ;;  %v2207_v8 = vpop.f32.mrf.mxu0 }
 0x2f1   : > { %v2712_v11 = vpop.f32.mrf.mxu3  ;;  %v2376_v54 = vpop.f32.mrf.mxu1 }
 0x2f2   : > { %v2713_v18 = vadd.f32 %v2712_v11, %v2543_v34  ;;  %v2377_v13 = vadd.f32 %v2376_v54, %v2207_v8 }
 0x2f4   : > { %v3642_v55 = vpack.c.bf16 %v2713_v18, %v2375_v19 }
 0x2f6   : > { %3770 = vst [vmem:[%s5201_s19 + $0x48] sm:$0xff] %v3642_v55 }
 0x2f8   : > { %v2545_v63 = vpop.f32.mrf.mxu2  ;;  %v2210_v53 = vpop.f32.mrf.mxu0 }
 0x2f9   : > { %v2714_v51 = vpop.f32.mrf.mxu3  ;;  %v2379_v14 = vpop.f32.mrf.mxu1 }
 0x2fa   : > { %v2715_v23 = vadd.f32 %v2714_v51, %v2545_v63  ;;  %v2380_v46 = vadd.f32 %v2379_v14, %v2210_v53 }
 0x2fb   : > { %2249 = vmatmul.bf16.gmra.mxu0 %v5232_v25 }
 0x2fc   : > { %v3644_v42 = vpack.c.bf16 %v2715_v23, %v2377_v13  ;;  %2418 = vmatmul.bf16.gmra.mxu1 %v5234_v31 }
 0x2fd   : > { %2587 = vmatmul.bf16.gmra.mxu2 %v5232_v25 }
 0x2fe   : > { %3772 = vst [vmem:[%s5201_s19 + $0x58] sm:$0xff] %v3644_v42  ;;  %2756 = vmatmul.bf16.gmra.mxu3 %v5234_v31 }
 0x300   : > { %v2548_v26 = vpop.f32.mrf.mxu2  ;;  %v2212_v15 = vpop.f32.mrf.mxu0 }
 0x301   : > { %v2717_v27 = vpop.f32.mrf.mxu3  ;;  %v2381_v2 = vpop.f32.mrf.mxu1 }
 0x302   : > { %v2718_v39 = vadd.f32 %v2717_v27, %v2548_v26  ;;  %v2382_v62 = vadd.f32 %v2381_v2, %v2212_v15 }
 0x304   : > { %v3646_v43 = vpack.c.bf16 %v2718_v39, %v2380_v46 }
 0x306   : > { %3774 = vst [vmem:[%s5201_s19 + $0x68] sm:$0xff] %v3646_v43 }
 0x308   : > { %v2550_v47 = vpop.f32.mrf.mxu2  ;;  %v2215_v10 = vpop.f32.mrf.mxu0 }
 0x309   : > { %v2719_v41 = vpop.f32.mrf.mxu3  ;;  %v2384_v37 = vpop.f32.mrf.mxu1 }
 0x30a   : > { %v2720_v0 = vadd.f32 %v2719_v41, %v2550_v47  ;;  %v2385_v31 = vadd.f32 %v2384_v37, %v2215_v10 }
 0x30b   : > { %2254 = vmatmul.bf16.gmra.mxu0 %v5242_v58 }
 0x30c   : > { %v3648_v25 = vpack.c.bf16 %v2720_v0, %v2382_v62  ;;  %2423 = vmatmul.bf16.gmra.mxu1 %v5244_v1 }
 0x30d   : > { %2592 = vmatmul.bf16.gmra.mxu2 %v5242_v58 }
 0x30e   : > { %3776 = vst [vmem:[%s5201_s19 + $0x78] sm:$0xff] %v3648_v25  ;;  %2761 = vmatmul.bf16.gmra.mxu3 %v5244_v1 }
 0x310   : > { %v2553_v12 = vpop.f32.mrf.mxu2  ;;  %v2217_v60 = vpop.f32.mrf.mxu0 }
 0x311   : > { %v2722_v4 = vpop.f32.mrf.mxu3  ;;  %v2386_v32 = vpop.f32.mrf.mxu1 }
 0x312   : > { %v2723_v61 = vadd.f32 %v2722_v4, %v2553_v12  ;;  %v2387_v22 = vadd.f32 %v2386_v32, %v2217_v60 }
 0x314   : > { %v3650_v33 = vpack.c.bf16 %v2723_v61, %v2385_v31 }
 0x316   : > { %3778 = vst [vmem:[%s5201_s19 + $0x88] sm:$0xff] %v3650_v33 }
 0x318   : > { %v2555_v38 = vpop.f32.mrf.mxu2  ;;  %v2220_v21 = vpop.f32.mrf.mxu0 }
 0x319   : > { %v2724_v20 = vpop.f32.mrf.mxu3  ;;  %v2389_v16 = vpop.f32.mrf.mxu1 }
 0x31a   : > { %v2725_v17 = vadd.f32 %v2724_v20, %v2555_v38  ;;  %v2390_v1 = vadd.f32 %v2389_v16, %v2220_v21 }
 0x31b   : > { %2259 = vmatmul.bf16.gmra.mxu0 %v5252_v24 }
 0x31c   : > { %v3652_v58 = vpack.c.bf16 %v2725_v17, %v2387_v22  ;;  %2428 = vmatmul.bf16.gmra.mxu1 %v5254_v30 }
 0x31d   : > { %2597 = vmatmul.bf16.gmra.mxu2 %v5252_v24 }
 0x31e   : > { %3780 = vst [vmem:[%s5201_s19 + $0x98] sm:$0xff] %v3652_v58  ;;  %2766 = vmatmul.bf16.gmra.mxu3 %v5254_v30 }
 0x320   : > { %v2558_v19 = vpop.f32.mrf.mxu2  ;;  %v2222_v11 = vpop.f32.mrf.mxu0 }
 0x321   : > { %v2727_v34 = vpop.f32.mrf.mxu3  ;;  %v2391_v18 = vpop.f32.mrf.mxu1 }
 0x322   : > { %v2728_v8 = vadd.f32 %v2727_v34, %v2558_v19  ;;  %v2392_v53 = vadd.f32 %v2391_v18, %v2222_v11 }
 0x324   : > { %v3654_v54 = vpack.c.bf16 %v2728_v8, %v2390_v1 }
 0x326   : > { %3782 = vst [vmem:[%s5201_s19 + $0xa8] sm:$0xff] %v3654_v54 }
 0x328   : > { %v2560_v55 = vpop.f32.mrf.mxu2  ;;  %v2225_v51 = vpop.f32.mrf.mxu0 }
 0x329   : > { %v2729_v63 = vpop.f32.mrf.mxu3  ;;  %v2394_v23 = vpop.f32.mrf.mxu1 }
 0x32a   : > { %v2730_v13 = vadd.f32 %v2729_v63, %v2560_v55  ;;  %v2395_v30 = vadd.f32 %v2394_v23, %v2225_v51 }
 0x32b   : > { %2264 = vmatmul.bf16.gmra.mxu0 %v5262_v59 }
 0x32c   : > { %v3656_v24 = vpack.c.bf16 %v2730_v13, %v2392_v53  ;;  %2433 = vmatmul.bf16.gmra.mxu1 %v5264_v3 }
 0x32d   : > { %2602 = vmatmul.bf16.gmra.mxu2 %v5262_v59 }
 0x32e   : > { %3784 = vst [vmem:[%s5201_s19 + $0xb8] sm:$0xff] %v3656_v24  ;;  %2771 = vmatmul.bf16.gmra.mxu3 %v5264_v3 }
 0x330   : > { %v2563_v14 = vpop.f32.mrf.mxu2  ;;  %v2227_v46 = vpop.f32.mrf.mxu0 }
 0x331   : > { %v2732_v42 = vpop.f32.mrf.mxu3  ;;  %v2396_v27 = vpop.f32.mrf.mxu1 }
 0x332   : > { %v2733_v26 = vadd.f32 %v2732_v42, %v2563_v14  ;;  %v2397_v47 = vadd.f32 %v2396_v27, %v2227_v46 }
 0x334   : > { %v3658_v15 = vpack.c.bf16 %v2733_v26, %v2395_v30 }
 0x336   : > { %3786 = vst [vmem:[%s5201_s19 + $0xc8] sm:$0xff] %v3658_v15 }
 0x338   : > { %v2565_v39 = vpop.f32.mrf.mxu2  ;;  %v2230_v43 = vpop.f32.mrf.mxu0 }
 0x339   : > { %v2734_v2 = vpop.f32.mrf.mxu3  ;;  %v2399_v10 = vpop.f32.mrf.mxu1 }
 0x33a   : > { %v2735_v41 = vadd.f32 %v2734_v2, %v2565_v39  ;;  %v2400_v3 = vadd.f32 %v2399_v10, %v2230_v43 }
 0x33b   : > { %2269 = vmatmul.bf16.gmra.mxu0 %v5280_v49 }
 0x33c   : > { %v3660_v59 = vpack.c.bf16 %v2735_v41, %v2397_v47  ;;  %2438 = vmatmul.bf16.gmra.mxu1 %v5282_v57 }
 0x33d   : > { %2607 = vmatmul.bf16.gmra.mxu2 %v5280_v49 }
 0x33e   : > { %3788 = vst [vmem:[%s5201_s19 + $0xd8] sm:$0xff] %v3660_v59  ;;  %2776 = vmatmul.bf16.gmra.mxu3 %v5282_v57 }
 0x340   : > { %v2568_v62 = vpop.f32.mrf.mxu2  ;;  %v2232_v37 = vpop.f32.mrf.mxu0 }
 0x341   : > { %v2737_v0 = vpop.f32.mrf.mxu3  ;;  %v2401_v31 = vpop.f32.mrf.mxu1 }
 0x342   : > { %v2738_v25 = vadd.f32 %v2737_v0, %v2568_v62  ;;  %v2402_v32 = vadd.f32 %v2401_v31, %v2232_v37 }
 0x344   : > { %v3662_v12 = vpack.c.bf16 %v2738_v25, %v2400_v3 }
 0x346   : > { %3790 = vst [vmem:[%s5201_s19 + $0xe8] sm:$0xff] %v3662_v12 }
 0x348   : > { %v2570_v4 = vpop.f32.mrf.mxu2  ;;  %v2235_v61 = vpop.f32.mrf.mxu0 }
 0x349   : > { %v2739_v60 = vpop.f32.mrf.mxu3  ;;  %v2404_v38 = vpop.f32.mrf.mxu1 }
 0x34a   : > { %v2740_v33 = vadd.f32 %v2739_v60, %v2570_v4  ;;  %v2405_v57 = vadd.f32 %v2404_v38, %v2235_v61 }
 0x34b   : > { %2274 = vmatmul.bf16.gmra.mxu0 %v5290_v28 }
 0x34c   : > { %v3664_v49 = vpack.c.bf16 %v2740_v33, %v2402_v32  ;;  %2443 = vmatmul.bf16.gmra.mxu1 %v5292_v35 }
 0x34d   : > { %2612 = vmatmul.bf16.gmra.mxu2 %v5290_v28 }
 0x34e   : > { %3792 = vst [vmem:[%s5201_s19 + $0xf8] sm:$0xff] %v3664_v49  ;;  %2781 = vmatmul.bf16.gmra.mxu3 %v5292_v35 }
 0x350   : > { %v2573_v20 = vpop.f32.mrf.mxu2  ;;  %v2237_v22 = vpop.f32.mrf.mxu0 }
 0x351   : > { %v2742_v21 = vpop.f32.mrf.mxu3  ;;  %v2406_v16 = vpop.f32.mrf.mxu1 }
 0x352   : > { %v2743_v17 = vadd.f32 %v2742_v21, %v2573_v20  ;;  %v2407_v11 = vadd.f32 %v2406_v16, %v2237_v22 }
 0x354   : > { %v3666_v58 = vpack.c.bf16 %v2743_v17, %v2405_v57 }
 0x356   : > { %3794 = vst [vmem:[%s5201_s19 + $0x108] sm:$0xff] %v3666_v58 }
 0x358   : > { %v2575_v1 = vpop.f32.mrf.mxu2  ;;  %v2240_v34 = vpop.f32.mrf.mxu0 }
 0x359   : > { %v2744_v19 = vpop.f32.mrf.mxu3  ;;  %v2409_v18 = vpop.f32.mrf.mxu1 }
 0x35a   : > { %v2745_v8 = vadd.f32 %v2744_v19, %v2575_v1  ;;  %v2410_v35 = vadd.f32 %v2409_v18, %v2240_v34 }
 0x35b   : > { %2279 = vmatmul.bf16.gmra.mxu0 %v5300_v6 }
 0x35c   : > { %v3668_v28 = vpack.c.bf16 %v2745_v8, %v2407_v11  ;;  %2448 = vmatmul.bf16.gmra.mxu1 %v5302_v9 }
 0x35d   : > { %2617 = vmatmul.bf16.gmra.mxu2 %v5300_v6 }
 0x35e   : > { %3796 = vst [vmem:[%s5201_s19 + $0x118] sm:$0xff] %v3668_v28  ;;  %2786 = vmatmul.bf16.gmra.mxu3 %v5302_v9 }
 0x360   : > { %v2578_v54 = vpop.f32.mrf.mxu2  ;;  %v2242_v63 = vpop.f32.mrf.mxu0 }
 0x361   : > { %v2747_v55 = vpop.f32.mrf.mxu3  ;;  %v2411_v53 = vpop.f32.mrf.mxu1 }
 0x362   : > { %v2748_v51 = vadd.f32 %v2747_v55, %v2578_v54  ;;  %v2412_v14 = vadd.f32 %v2411_v53, %v2242_v63 }
 0x364   : > { %v3670_v13 = vpack.c.bf16 %v2748_v51, %v2410_v35 }
 0x366   : > { %3798 = vst [vmem:[%s5201_s19 + $0x128] sm:$0xff] %v3670_v13 }
 0x368   : > { %v2580_v23 = vpop.f32.mrf.mxu2  ;;  %v2245_v30 = vpop.f32.mrf.mxu0 }
 0x369   : > { %v2749_v24 = vpop.f32.mrf.mxu3  ;;  %v2414_v46 = vpop.f32.mrf.mxu1 }
 0x36a   : > { %v2750_v42 = vadd.f32 %v2749_v24, %v2580_v23  ;;  %v2415_v9 = vadd.f32 %v2414_v46, %v2245_v30  ;;  %v5785_v46 = vld [vmem:[#allocation14_spill] sm:$0xff] }
 0x36b   : > { %2284 = vmatmul.bf16.gmra.mxu0 %v5310_v44 }
 0x36c   : > { %v3672_v6 = vpack.c.bf16 %v2750_v42, %v2412_v14  ;;  %2453 = vmatmul.bf16.gmra.mxu1 %v5312_v50  ;;  %v5784_v42 = vld [vmem:[#allocation13_spill] sm:$0xff] }
 0x36d   : > { %2622 = vmatmul.bf16.gmra.mxu2 %v5310_v44 }
 0x36e   : > { %3800 = vst [vmem:[%s5201_s19 + $0x138] sm:$0xff] %v3672_v6  ;;  %2791 = vmatmul.bf16.gmra.mxu3 %v5312_v50 }
 0x370   : > { %v2583_v26 = vpop.f32.mrf.mxu2  ;;  %v2247_v15 = vpop.f32.mrf.mxu0 }
 0x371   : > { %v2752_v27 = vpop.f32.mrf.mxu3  ;;  %v2416_v2 = vpop.f32.mrf.mxu1 }
 0x372   : > { %v2753_v39 = vadd.f32 %v2752_v27, %v2583_v26  ;;  %v2417_v59 = vadd.f32 %v2416_v2, %v2247_v15 }
 0x374   : > { %v3674_v43 = vpack.c.bf16 %v2753_v39, %v2415_v9 }
 0x376   : > { %3802 = vst [vmem:[%s5201_s19 + $0x148] sm:$0xff] %v3674_v43 }
 0x378   : > { %v2585_v47 = vpop.f32.mrf.mxu2  ;;  %v2250_v10 = vpop.f32.mrf.mxu0 }
 0x379   : > { %v2754_v41 = vpop.f32.mrf.mxu3  ;;  %v2419_v62 = vpop.f32.mrf.mxu1 }
 0x37a   : > { %v2755_v3 = vadd.f32 %v2754_v41, %v2585_v47  ;;  %v2420_v50 = vadd.f32 %v2419_v62, %v2250_v10 }
 0x37b   : > { %2289 = vmatmul.bf16.gmra.mxu0 %v5328_v56 }
 0x37c   : > { %v3676_v44 = vpack.c.bf16 %v2755_v3, %v2417_v59  ;;  %2458 = vmatmul.bf16.gmra.mxu1 %v5330_v5 }
 0x37d   : > { %2627 = vmatmul.bf16.gmra.mxu2 %v5328_v56 }
 0x37e   : > { %3804 = vst [vmem:[%s5201_s19 + $0x158] sm:$0xff] %v3676_v44  ;;  %2796 = vmatmul.bf16.gmra.mxu3 %v5330_v5  ;;  %v5786_v44 = vld [vmem:[#allocation15_spill] sm:$0xff] }
 0x380   : > { %v2588_v0 = vpop.f32.mrf.mxu2  ;;  %v2252_v25 = vpop.f32.mrf.mxu0 }
 0x381   : > { %v2757_v37 = vpop.f32.mrf.mxu3  ;;  %v2421_v12 = vpop.f32.mrf.mxu1 }
 0x382   : > { %v2758_v31 = vadd.f32 %v2757_v37, %v2588_v0  ;;  %v2422_v33 = vadd.f32 %v2421_v12, %v2252_v25 }
 0x384   : > { %v3678_v4 = vpack.c.bf16 %v2758_v31, %v2420_v50  ;;  %v5787_v50 = vld [vmem:[#allocation16_spill] sm:$0xff] }
 0x386   : > { %3806 = vst [vmem:[%s5201_s19 + $0x168] sm:$0xff] %v3678_v4 }
 0x388   : > { %v2590_v60 = vpop.f32.mrf.mxu2  ;;  %v2255_v32 = vpop.f32.mrf.mxu0 }
 0x389   : > { %v2759_v61 = vpop.f32.mrf.mxu3  ;;  %v2424_v49 = vpop.f32.mrf.mxu1 }
 0x38a   : > { %v2760_v38 = vadd.f32 %v2759_v61, %v2590_v60  ;;  %v2425_v5 = vadd.f32 %v2424_v49, %v2255_v32 }
 0x38b   : > { %2294 = vmatmul.bf16.gmra.mxu0 %v5338_v40 }
 0x38c   : > { %v3680_v56 = vpack.c.bf16 %v2760_v38, %v2422_v33  ;;  %2463 = vmatmul.bf16.gmra.mxu1 %v5340_v48 }
 0x38d   : > { %2632 = vmatmul.bf16.gmra.mxu2 %v5338_v40 }
 0x38e   : > { %3808 = vst [vmem:[%s5201_s19 + $0x178] sm:$0xff] %v3680_v56  ;;  %2801 = vmatmul.bf16.gmra.mxu3 %v5340_v48  ;;  %v5783_v48 = vld [vmem:[#allocation12_spill] sm:$0xff] }
 0x390   : > { %v2593_v57 = vpop.f32.mrf.mxu2  ;;  %v2257_v21 = vpop.f32.mrf.mxu0 }
 0x391   : > { %v2762_v20 = vpop.f32.mrf.mxu3  ;;  %v2426_v17 = vpop.f32.mrf.mxu1 }
 0x392   : > { %v2763_v22 = vadd.f32 %v2762_v20, %v2593_v57  ;;  %v2427_v34 = vadd.f32 %v2426_v17, %v2257_v21  ;;  %v5788_v57 = vld [vmem:[#allocation17_spill] sm:$0xff]  ;;  %v5789_v20 = vld [vmem:[#allocation18_spill] sm:$0xff] }
 0x394   : > { %v3682_v16 = vpack.c.bf16 %v2763_v22, %v2425_v5 }
 0x396   : > { %3810 = vst [vmem:[%s5201_s19 + $0x188] sm:$0xff] %v3682_v16 }
 0x398   : > { %v2595_v58 = vpop.f32.mrf.mxu2  ;;  %v2260_v19 = vpop.f32.mrf.mxu0 }
 0x399   : > { %v2764_v1 = vpop.f32.mrf.mxu3  ;;  %v2429_v8 = vpop.f32.mrf.mxu1 }
 0x39a   : > { %v2765_v11 = vadd.f32 %v2764_v1, %v2595_v58  ;;  %v2430_v18 = vadd.f32 %v2429_v8, %v2260_v19 }
 0x39b   : > { %2299 = vmatmul.bf16.gmra.mxu0 %v5348_v36 }
 0x39c   : > { %v3684_v40 = vpack.c.bf16 %v2765_v11, %v2427_v34  ;;  %2468 = vmatmul.bf16.gmra.mxu1 %v5783_v48 }
 0x39d   : > { %2637 = vmatmul.bf16.gmra.mxu2 %v5348_v36 }
 0x39e   : > { %3812 = vst [vmem:[%s5201_s19 + $0x198] sm:$0xff] %v3684_v40  ;;  %2806 = vmatmul.bf16.gmra.mxu3 %v5783_v48 }
 0x3a0   : > { %v2598_v28 = vpop.f32.mrf.mxu2  ;;  %v2262_v54 = vpop.f32.mrf.mxu0 }
 0x3a1   : > { %v2767_v35 = vpop.f32.mrf.mxu3  ;;  %v2431_v63 = vpop.f32.mrf.mxu1 }
 0x3a2   : > { %v2768_v55 = vadd.f32 %v2767_v35, %v2598_v28  ;;  %v2432_v24 = vadd.f32 %v2431_v63, %v2262_v54  ;;  %v5790_v35 = vld [vmem:[#allocation19_spill] sm:$0xff]  ;;  %v5791_v54 = vld [vmem:[#allocation20_spill] sm:$0xff] }
 0x3a4   : > { %v3686_v51 = vpack.c.bf16 %v2768_v55, %v2430_v18 }
 0x3a6   : > { %3814 = vst [vmem:[%s5201_s19 + $0x1a8] sm:$0xff] %v3686_v51 }
 0x3a8   : > { %v2600_v53 = vpop.f32.mrf.mxu2  ;;  %v2265_v23 = vpop.f32.mrf.mxu0 }
 0x3a9   : > { %v2769_v13 = vpop.f32.mrf.mxu3  ;;  %v2434_v14 = vpop.f32.mrf.mxu1 }
 0x3aa   : > { %v2770_v30 = vadd.f32 %v2769_v13, %v2600_v53  ;;  %v2435_v6 = vadd.f32 %v2434_v14, %v2265_v23 }
 0x3ab   : > { %2304 = vmatmul.bf16.gmra.mxu0 %v5784_v42 }
 0x3ac   : > { %v3688_v36 = vpack.c.bf16 %v2770_v30, %v2432_v24  ;;  %2473 = vmatmul.bf16.gmra.mxu1 %v5785_v46 }
 0x3ad   : > { %2642 = vmatmul.bf16.gmra.mxu2 %v5784_v42 }
 0x3ae   : > { %3816 = vst [vmem:[%s5201_s19 + $0x1b8] sm:$0xff] %v3688_v36  ;;  %2811 = vmatmul.bf16.gmra.mxu3 %v5785_v46 }
 0x3b0   : > { %v2603_v9 = vpop.f32.mrf.mxu2  ;;  %v2267_v27 = vpop.f32.mrf.mxu0 }
 0x3b1   : > { %v2772_v26 = vpop.f32.mrf.mxu3  ;;  %v2436_v39 = vpop.f32.mrf.mxu1 }
 0x3b2   : > { %v2773_v15 = vadd.f32 %v2772_v26, %v2603_v9  ;;  %v2437_v10 = vadd.f32 %v2436_v39, %v2267_v27  ;;  %v5792_v26 = vld [vmem:[#allocation21_spill] sm:$0xff]  ;;  %v5793_v27 = vld [vmem:[#allocation22_spill] sm:$0xff] }
 0x3b4   : > { %v3690_v2 = vpack.c.bf16 %v2773_v15, %v2435_v6 }
 0x3b6   : > { %3818 = vst [vmem:[%s5201_s19 + $0x1c8] sm:$0xff] %v3690_v2 }
 0x3b8   : > { %v2605_v43 = vpop.f32.mrf.mxu2  ;;  %v2270_v41 = vpop.f32.mrf.mxu0 }
 0x3b9   : > { %v2774_v47 = vpop.f32.mrf.mxu3  ;;  %v2439_v3 = vpop.f32.mrf.mxu1 }
 0x3ba   : > { %v2775_v59 = vadd.f32 %v2774_v47, %v2605_v43  ;;  %v2440_v0 = vadd.f32 %v2439_v3, %v2270_v41 }
 0x3bb   : > { %2309 = vmatmul.bf16.gmra.mxu0 %v5786_v44 }
 0x3bc   : > { %v3692_v62 = vpack.c.bf16 %v2775_v59, %v2437_v10  ;;  %2478 = vmatmul.bf16.gmra.mxu1 %v5787_v50 }
 0x3bd   : > { %2647 = vmatmul.bf16.gmra.mxu2 %v5786_v44 }
 0x3be   : > { %3820 = vst [vmem:[%s5201_s19 + $0x1d8] sm:$0xff] %v3692_v62  ;;  %2816 = vmatmul.bf16.gmra.mxu3 %v5787_v50 }
 0x3c0   : > { %v2608_v37 = vpop.f32.mrf.mxu2  ;;  %v2272_v31 = vpop.f32.mrf.mxu0 }
 0x3c1   : > { %v2777_v25 = vpop.f32.mrf.mxu3  ;;  %v2441_v4 = vpop.f32.mrf.mxu1 }
 0x3c2   : > { %v2778_v12 = vadd.f32 %v2777_v25, %v2608_v37  ;;  %v2442_v38 = vadd.f32 %v2441_v4, %v2272_v31 }
 0x3c4   : > { %v3694_v60 = vpack.c.bf16 %v2778_v12, %v2440_v0 }
 0x3c6   : > { %3822 = vst [vmem:[%s5201_s19 + $0x1e8] sm:$0xff] %v3694_v60 }
 0x3c8   : > { %v2610_v61 = vpop.f32.mrf.mxu2  ;;  %v2275_v33 = vpop.f32.mrf.mxu0 }
 0x3c9   : > { %v2779_v32 = vpop.f32.mrf.mxu3  ;;  %v2444_v56 = vpop.f32.mrf.mxu1 }
 0x3ca   : > { %v2780_v49 = vadd.f32 %v2779_v32, %v2610_v61  ;;  %v2445_v21 = vadd.f32 %v2444_v56, %v2275_v33 }
 0x3cb   : > { %2314 = vmatmul.bf16.gmra.mxu0 %v5788_v57 }
 0x3cc   : > { %v3696_v5 = vpack.c.bf16 %v2780_v49, %v2442_v38  ;;  %2483 = vmatmul.bf16.gmra.mxu1 %v5789_v20 }
 0x3cd   : > { %2652 = vmatmul.bf16.gmra.mxu2 %v5788_v57 }
 0x3ce   : > { %3824 = vst [vmem:[%s5201_s19 + $0x1f8] sm:$0xff] %v3696_v5  ;;  %2821 = vmatmul.bf16.gmra.mxu3 %v5789_v20  ;;  %v5794_v20 = vld [vmem:[#allocation23_spill] sm:$0xff] }
 0x3d0   : > { %v2613_v22 = vpop.f32.mrf.mxu2  ;;  %v2277_v16 = vpop.f32.mrf.mxu0 }
 0x3d1   : > { %v2782_v17 = vpop.f32.mrf.mxu3  ;;  %v2446_v1 = vpop.f32.mrf.mxu1 }
 0x3d2   : > { %v2783_v58 = vadd.f32 %v2782_v17, %v2613_v22  ;;  %v2447_v40 = vadd.f32 %v2446_v1, %v2277_v16 }
 0x3d4   : > { %v3698_v19 = vpack.c.bf16 %v2783_v58, %v2445_v21 }
 0x3d6   : > { %3826 = vst [vmem:[%s5201_s19 + $0x208] sm:$0xff] %v3698_v19 }
 0x3d8   : > { %v2615_v34 = vpop.f32.mrf.mxu2  ;;  %v2280_v8 = vpop.f32.mrf.mxu0 }
 0x3d9   : > { %v2784_v11 = vpop.f32.mrf.mxu3  ;;  %v2449_v18 = vpop.f32.mrf.mxu1 }
 0x3da   : > { %v2785_v48 = vadd.f32 %v2784_v11, %v2615_v34  ;;  %v2450_v55 = vadd.f32 %v2449_v18, %v2280_v8 }
 0x3db   : > { %2319 = vmatmul.bf16.gmra.mxu0 %v5790_v35 }
 0x3dc   : > { %v3700_v28 = vpack.c.bf16 %v2785_v48, %v2447_v40  ;;  %2488 = vmatmul.bf16.gmra.mxu1 %v5791_v54 }
 0x3dd   : > { %2657 = vmatmul.bf16.gmra.mxu2 %v5790_v35  ;;  %v5796_v35 = vld [vmem:[#allocation25_spill] sm:$0xff] }
 0x3de   : > { %3828 = vst [vmem:[%s5201_s19 + $0x218] sm:$0xff] %v3700_v28  ;;  %2826 = vmatmul.bf16.gmra.mxu3 %v5791_v54  ;;  %v5797_v54 = vld [vmem:[#allocation26_spill] sm:$0xff] }
 0x3e0   : > { %v2618_v63 = vpop.f32.mrf.mxu2  ;;  %v2282_v53 = vpop.f32.mrf.mxu0 }
 0x3e1   : > { %v2787_v51 = vpop.f32.mrf.mxu3  ;;  %v2451_v23 = vpop.f32.mrf.mxu1 }
 0x3e2   : > { %v2788_v13 = vadd.f32 %v2787_v51, %v2618_v63  ;;  %v2452_v42 = vadd.f32 %v2451_v23, %v2282_v53 }
 0x3e4   : > { %v3702_v24 = vpack.c.bf16 %v2788_v13, %v2450_v55 }
 0x3e6   : > { %3830 = vst [vmem:[%s5201_s19 + $0x228] sm:$0xff] %v3702_v24 }
 0x3e8   : > { %v2620_v30 = vpop.f32.mrf.mxu2  ;;  %v2285_v36 = vpop.f32.mrf.mxu0 }
 0x3e9   : > { %v2789_v14 = vpop.f32.mrf.mxu3  ;;  %v2454_v6 = vpop.f32.mrf.mxu1 }
 0x3ea   : > { %v2790_v46 = vadd.f32 %v2789_v14, %v2620_v30  ;;  %v2455_v15 = vadd.f32 %v2454_v6, %v2285_v36 }
 0x3eb   : > { %2324 = vmatmul.bf16.gmra.mxu0 %v5792_v26 }
 0x3ec   : > { %v3704_v9 = vpack.c.bf16 %v2790_v46, %v2452_v42  ;;  %2493 = vmatmul.bf16.gmra.mxu1 %v5793_v27 }
 0x3ed   : > { %2662 = vmatmul.bf16.gmra.mxu2 %v5792_v26  ;;  %v5798_v26 = vld [vmem:[#allocation27_spill] sm:$0xff] }
 0x3ee   : > { %3832 = vst [vmem:[%s5201_s19 + $0x238] sm:$0xff] %v3704_v9  ;;  %2831 = vmatmul.bf16.gmra.mxu3 %v5793_v27  ;;  %v5799_v27 = vld [vmem:[#allocation28_spill] sm:$0xff] }
 0x3f0   : > { %v2623_v39 = vpop.f32.mrf.mxu2  ;;  %v2287_v43 = vpop.f32.mrf.mxu0 }
 0x3f1   : > { %v2792_v2 = vpop.f32.mrf.mxu3  ;;  %v2456_v41 = vpop.f32.mrf.mxu1 }
 0x3f2   : > { %v2793_v47 = vadd.f32 %v2792_v2, %v2623_v39  ;;  %v2457_v44 = vadd.f32 %v2456_v41, %v2287_v43 }
 0x3f4   : > { %v3706_v10 = vpack.c.bf16 %v2793_v47, %v2455_v15 }
 0x3f6   : > { %3834 = vst [vmem:[%s5201_s19 + $0x248] sm:$0xff] %v3706_v10 }
 0x3f8   : > { %v2625_v59 = vpop.f32.mrf.mxu2  ;;  %v2290_v62 = vpop.f32.mrf.mxu0 }
 0x3f9   : > { %v2794_v3 = vpop.f32.mrf.mxu3  ;;  %v2459_v0 = vpop.f32.mrf.mxu1 }
 0x3fa   : > { %v2795_v50 = vadd.f32 %v2794_v3, %v2625_v59  ;;  %v2460_v25 = vadd.f32 %v2459_v0, %v2290_v62 }
 0x3fb   : > { %2329 = vmatmul.bf16.gmra.mxu0 %v5424_v52 }
 0x3fc   : > { %v3708_v37 = vpack.c.bf16 %v2795_v50, %v2457_v44  ;;  %2498 = vmatmul.bf16.gmra.mxu1 %v5426_v29 }
 0x3fd   : > { %2667 = vmatmul.bf16.gmra.mxu2 %v5424_v52 }
 0x3fe   : > { %3836 = vst [vmem:[%s5201_s19 + $0x258] sm:$0xff] %v3708_v37  ;;  %2836 = vmatmul.bf16.gmra.mxu3 %v5426_v29  ;;  %v5795_v29 = vld [vmem:[#allocation24_spill] sm:$0xff] }
 0x400   : > { %v2628_v31 = vpop.f32.mrf.mxu2  ;;  %v2292_v4 = vpop.f32.mrf.mxu0 }
 0x401   : > { %v2797_v12 = vpop.f32.mrf.mxu3  ;;  %v2461_v61 = vpop.f32.mrf.mxu1 }
 0x402   : > { %v2798_v60 = vadd.f32 %v2797_v12, %v2628_v31  ;;  %v2462_v56 = vadd.f32 %v2461_v61, %v2292_v4 }
 0x404   : > { %v3710_v32 = vpack.c.bf16 %v2798_v60, %v2460_v25 }
 0x406   : > { %3838 = vst [vmem:[%s5201_s19 + $0x268] sm:$0xff] %v3710_v32 }
 0x408   : > { %v2630_v33 = vpop.f32.mrf.mxu2  ;;  %v2295_v49 = vpop.f32.mrf.mxu0 }
 0x409   : > { %v2799_v38 = vpop.f32.mrf.mxu3  ;;  %v2464_v57 = vpop.f32.mrf.mxu1 }
 0x40a   : > { %v2800_v5 = vadd.f32 %v2799_v38, %v2630_v33  ;;  %v2465_v21 = vadd.f32 %v2464_v57, %v2295_v49 }
 0x40b   : > { %2334 = vmatmul.bf16.gmra.mxu0 %v5794_v20 }
 0x40c   : > { %v3712_v52 = vpack.c.bf16 %v2800_v5, %v2462_v56  ;;  %2503 = vmatmul.bf16.gmra.mxu1 %v5795_v29 }
 0x40d   : > { %2672 = vmatmul.bf16.gmra.mxu2 %v5794_v20 }
 0x40e   : > { %3840 = vst [vmem:[%s5201_s19 + $0x278] sm:$0xff] %v3712_v52  ;;  %2841 = vmatmul.bf16.gmra.mxu3 %v5795_v29 }
 0x410   : > { %v2633_v22 = vpop.f32.mrf.mxu2  ;;  %v2297_v16 = vpop.f32.mrf.mxu0 }
 0x411   : > { %v2802_v17 = vpop.f32.mrf.mxu3  ;;  %v2466_v1 = vpop.f32.mrf.mxu1 }
 0x412   : > { %v2803_v58 = vadd.f32 %v2802_v17, %v2633_v22  ;;  %v2467_v40 = vadd.f32 %v2466_v1, %v2297_v16 }
 0x414   : > { %v3714_v19 = vpack.c.bf16 %v2803_v58, %v2465_v21 }
 0x416   : > { %3842 = vst [vmem:[%s5201_s19 + $0x288] sm:$0xff] %v3714_v19 }
 0x418   : > { %v2635_v34 = vpop.f32.mrf.mxu2  ;;  %v2300_v8 = vpop.f32.mrf.mxu0 }
 0x419   : > { %v2804_v11 = vpop.f32.mrf.mxu3  ;;  %v2469_v18 = vpop.f32.mrf.mxu1 }
 0x41a   : > { %v2805_v48 = vadd.f32 %v2804_v11, %v2635_v34  ;;  %v2470_v55 = vadd.f32 %v2469_v18, %v2300_v8 }
 0x41b   : > { %2339 = vmatmul.bf16.gmra.mxu0 %v5796_v35 }
 0x41c   : > { %v3716_v28 = vpack.c.bf16 %v2805_v48, %v2467_v40  ;;  %2508 = vmatmul.bf16.gmra.mxu1 %v5797_v54 }
 0x41d   : > { %2677 = vmatmul.bf16.gmra.mxu2 %v5796_v35 }
 0x41e   : > { %3844 = vst [vmem:[%s5201_s19 + $0x298] sm:$0xff] %v3716_v28  ;;  %2846 = vmatmul.bf16.gmra.mxu3 %v5797_v54 }
 0x420   : > { %v2638_v63 = vpop.f32.mrf.mxu2  ;;  %v2302_v53 = vpop.f32.mrf.mxu0 }
 0x421   : > { %v2807_v51 = vpop.f32.mrf.mxu3  ;;  %v2471_v23 = vpop.f32.mrf.mxu1 }
 0x422   : > { %v2808_v13 = vadd.f32 %v2807_v51, %v2638_v63  ;;  %v2472_v42 = vadd.f32 %v2471_v23, %v2302_v53 }
 0x424   : > { %v3718_v24 = vpack.c.bf16 %v2808_v13, %v2470_v55 }
 0x426   : > { %3846 = vst [vmem:[%s5201_s19 + $0x2a8] sm:$0xff] %v3718_v24 }
 0x428   : > { %v2640_v30 = vpop.f32.mrf.mxu2  ;;  %v2305_v36 = vpop.f32.mrf.mxu0 }
 0x429   : > { %v2809_v14 = vpop.f32.mrf.mxu3  ;;  %v2474_v6 = vpop.f32.mrf.mxu1 }
 0x42a   : > { %v2810_v46 = vadd.f32 %v2809_v14, %v2640_v30  ;;  %v2475_v15 = vadd.f32 %v2474_v6, %v2305_v36 }
 0x42b   : > { %2344 = vmatmul.bf16.gmra.mxu0 %v5798_v26 }
 0x42c   : > { %v3720_v9 = vpack.c.bf16 %v2810_v46, %v2472_v42  ;;  %2513 = vmatmul.bf16.gmra.mxu1 %v5799_v27 }
 0x42d   : > { %2682 = vmatmul.bf16.gmra.mxu2 %v5798_v26 }
 0x42e   : > { %3848 = vst [vmem:[%s5201_s19 + $0x2b8] sm:$0xff] %v3720_v9  ;;  %2851 = vmatmul.bf16.gmra.mxu3 %v5799_v27 }
 0x430   : > { %v2643_v39 = vpop.f32.mrf.mxu2  ;;  %v2307_v43 = vpop.f32.mrf.mxu0 }
 0x431   : > { %v2812_v2 = vpop.f32.mrf.mxu3  ;;  %v2476_v41 = vpop.f32.mrf.mxu1 }
 0x432   : > { %v2813_v47 = vadd.f32 %v2812_v2, %v2643_v39  ;;  %v2477_v44 = vadd.f32 %v2476_v41, %v2307_v43 }
 0x434   : > { %v3722_v10 = vpack.c.bf16 %v2813_v47, %v2475_v15 }
 0x436   : > { %3850 = vst [vmem:[%s5201_s19 + $0x2c8] sm:$0xff] %v3722_v10 }
 0x438   : > { %v2645_v59 = vpop.f32.mrf.mxu2  ;;  %v2310_v62 = vpop.f32.mrf.mxu0 }
 0x439   : > { %v2814_v3 = vpop.f32.mrf.mxu3  ;;  %v2479_v0 = vpop.f32.mrf.mxu1 }
 0x43a   : > { %v2815_v50 = vadd.f32 %v2814_v3, %v2645_v59  ;;  %v2480_v25 = vadd.f32 %v2479_v0, %v2310_v62 }
 0x43b   : > { %2349 = vmatmul.bf16.gmra.mxu0 %v5464_v7 }
 0x43c   : > { %v3724_v37 = vpack.c.bf16 %v2815_v50, %v2477_v44  ;;  %2518 = vmatmul.bf16.gmra.mxu1 %v5466_v45 }
 0x43d   : > { %2687 = vmatmul.bf16.gmra.mxu2 %v5464_v7 }
 0x43e   : > { %3852 = vst [vmem:[%s5201_s19 + $0x2d8] sm:$0xff] %v3724_v37  ;;  %2856 = vmatmul.bf16.gmra.mxu3 %v5466_v45 }
 0x440   : > { %v2648_v31 = vpop.f32.mrf.mxu2  ;;  %v2312_v4 = vpop.f32.mrf.mxu0 }
 0x441   : > { %v2817_v12 = vpop.f32.mrf.mxu3  ;;  %v2481_v61 = vpop.f32.mrf.mxu1 }
 0x442   : > { %v2818_v60 = vadd.f32 %v2817_v12, %v2648_v31  ;;  %v2482_v56 = vadd.f32 %v2481_v61, %v2312_v4 }
 0x444   : > { %v3726_v32 = vpack.c.bf16 %v2818_v60, %v2480_v25 }
 0x446   : > { %3854 = vst [vmem:[%s5201_s19 + $0x2e8] sm:$0xff] %v3726_v32 }
 0x448   : > { %v2650_v33 = vpop.f32.mrf.mxu2  ;;  %v2315_v49 = vpop.f32.mrf.mxu0 }
 0x449   : > { %v2819_v38 = vpop.f32.mrf.mxu3  ;;  %v2484_v57 = vpop.f32.mrf.mxu1 }
 0x44a   : > { %v2820_v5 = vadd.f32 %v2819_v38, %v2650_v33  ;;  %v2485_v45 = vadd.f32 %v2484_v57, %v2315_v49 }
 0x44c   : > { %v3728_v7 = vpack.c.bf16 %v2820_v5, %v2482_v56 }
 0x44e   : > { %3856 = vst [vmem:[%s5201_s19 + $0x2f8] sm:$0xff] %v3728_v7 }
 0x450   : > { %v2653_v52 = vpop.f32.mrf.mxu2  ;;  %v2317_v29 = vpop.f32.mrf.mxu0 }
 0x451   : > { %v2822_v20 = vpop.f32.mrf.mxu3  ;;  %v2486_v22 = vpop.f32.mrf.mxu1 }
 0x452   : > { %v2823_v21 = vadd.f32 %v2822_v20, %v2653_v52  ;;  %v2487_v19 = vadd.f32 %v2486_v22, %v2317_v29 }
 0x454   : > { %v3730_v17 = vpack.c.bf16 %v2823_v21, %v2485_v45 }
 0x456   : > { %3858 = vst [vmem:[%s5201_s19 + $0x308] sm:$0xff] %v3730_v17 }
 0x458   : > { %v2655_v16 = vpop.f32.mrf.mxu2  ;;  %v2320_v1 = vpop.f32.mrf.mxu0 }
 0x459   : > { %v2824_v58 = vpop.f32.mrf.mxu3  ;;  %v2489_v11 = vpop.f32.mrf.mxu1 }
 0x45a   : > { %v2825_v34 = vadd.f32 %v2824_v58, %v2655_v16  ;;  %v2490_v40 = vadd.f32 %v2489_v11, %v2320_v1 }
 0x45c   : > { %v3732_v8 = vpack.c.bf16 %v2825_v34, %v2487_v19 }
 0x45e   : > { %3860 = vst [vmem:[%s5201_s19 + $0x318] sm:$0xff] %v3732_v8 }
 0x460   : > { %v2658_v48 = vpop.f32.mrf.mxu2  ;;  %v2322_v28 = vpop.f32.mrf.mxu0 }
 0x461   : > { %v2827_v18 = vpop.f32.mrf.mxu3  ;;  %v2491_v54 = vpop.f32.mrf.mxu1 }
 0x462   : > { %v2828_v35 = vadd.f32 %v2827_v18, %v2658_v48  ;;  %v2492_v13 = vadd.f32 %v2491_v54, %v2322_v28 }
 0x464   : > { %v3734_v55 = vpack.c.bf16 %v2828_v35, %v2490_v40 }
 0x466   : > { %3862 = vst [vmem:[%s5201_s19 + $0x328] sm:$0xff] %v3734_v55 }
 0x468   : > { %v2660_v63 = vpop.f32.mrf.mxu2  ;;  %v2325_v53 = vpop.f32.mrf.mxu0 }
 0x469   : > { %v2829_v51 = vpop.f32.mrf.mxu3  ;;  %v2494_v24 = vpop.f32.mrf.mxu1 }
 0x46a   : > { %v2830_v23 = vadd.f32 %v2829_v51, %v2660_v63  ;;  %v2495_v14 = vadd.f32 %v2494_v24, %v2325_v53 }
 0x46c   : > { %v3736_v30 = vpack.c.bf16 %v2830_v23, %v2492_v13 }
 0x46e   : > { %3864 = vst [vmem:[%s5201_s19 + $0x338] sm:$0xff] %v3736_v30 }
 0x470   : > { %v2663_v36 = vpop.f32.mrf.mxu2  ;;  %v2327_v46 = vpop.f32.mrf.mxu0 }
 0x471   : > { %v2832_v42 = vpop.f32.mrf.mxu3  ;;  %v2496_v9 = vpop.f32.mrf.mxu1 }
 0x472   : > { %v2833_v6 = vadd.f32 %v2832_v42, %v2663_v36  ;;  %v2497_v2 = vadd.f32 %v2496_v9, %v2327_v46 }
 0x474   : > { %v3738_v26 = vpack.c.bf16 %v2833_v6, %v2495_v14 }
 0x476   : > { %3866 = vst [vmem:[%s5201_s19 + $0x348] sm:$0xff] %v3738_v26 }
 0x478   : > { %v2665_v27 = vpop.f32.mrf.mxu2  ;;  %v2330_v39 = vpop.f32.mrf.mxu0 }
 0x479   : > { %v2834_v15 = vpop.f32.mrf.mxu3  ;;  %v2499_v47 = vpop.f32.mrf.mxu1 }
 0x47a   : > { %v2835_v43 = vadd.f32 %v2834_v15, %v2665_v27  ;;  %v2500_v10 = vadd.f32 %v2499_v47, %v2330_v39 }
 0x47c   : > { %v3740_v41 = vpack.c.bf16 %v2835_v43, %v2497_v2 }
 0x47e   : > { %3868 = vst [vmem:[%s5201_s19 + $0x358] sm:$0xff] %v3740_v41 }
 0x480   : > { %v2668_v59 = vpop.f32.mrf.mxu2  ;;  %v2332_v62 = vpop.f32.mrf.mxu0 }
 0x481   : > { %v2837_v3 = vpop.f32.mrf.mxu3  ;;  %v2501_v50 = vpop.f32.mrf.mxu1 }
 0x482   : > { %v2838_v44 = vadd.f32 %v2837_v3, %v2668_v59  ;;  %v2502_v12 = vadd.f32 %v2501_v50, %v2332_v62 }
 0x484   : > { %v3742_v0 = vpack.c.bf16 %v2838_v44, %v2500_v10 }
 0x486   : > { %3870 = vst [vmem:[%s5201_s19 + $0x368] sm:$0xff] %v3742_v0 }
 0x488   : > { %v2670_v37 = vpop.f32.mrf.mxu2  ;;  %v2335_v31 = vpop.f32.mrf.mxu0 }
 0x489   : > { %v2839_v25 = vpop.f32.mrf.mxu3  ;;  %v2504_v60 = vpop.f32.mrf.mxu1 }
 0x48a   : > { %v2840_v4 = vadd.f32 %v2839_v25, %v2670_v37  ;;  %v2505_v32 = vadd.f32 %v2504_v60, %v2335_v31 }
 0x48c   : > { %v3744_v61 = vpack.c.bf16 %v2840_v4, %v2502_v12 }
 0x48e   : > { %3872 = vst [vmem:[%s5201_s19 + $0x378] sm:$0xff] %v3744_v61 }
 0x490   : > { %v2673_v33 = vpop.f32.mrf.mxu2  ;;  %v2337_v49 = vpop.f32.mrf.mxu0 }
 0x491   : > { %v2842_v38 = vpop.f32.mrf.mxu3  ;;  %v2506_v5 = vpop.f32.mrf.mxu1 }
 0x492   : > { %v2843_v56 = vadd.f32 %v2842_v38, %v2673_v33  ;;  %v2507_v20 = vadd.f32 %v2506_v5, %v2337_v49 }
 0x494   : > { %v3746_v57 = vpack.c.bf16 %v2843_v56, %v2505_v32 }
 0x496   : > { %3874 = vst [vmem:[%s5201_s19 + $0x388] sm:$0xff] %v3746_v57 }
 0x498   : > { %v2675_v7 = vpop.f32.mrf.mxu2  ;;  %v2340_v52 = vpop.f32.mrf.mxu0 }
 0x499   : > { %v2844_v45 = vpop.f32.mrf.mxu3  ;;  %v2509_v21 = vpop.f32.mrf.mxu1 }
 0x49a   : > { %v2845_v29 = vadd.f32 %v2844_v45, %v2675_v7  ;;  %v2510_v17 = vadd.f32 %v2509_v21, %v2340_v52 }
 0x49c   : > { %v3748_v22 = vpack.c.bf16 %v2845_v29, %v2507_v20 }
 0x49e   : > { %3876 = vst [vmem:[%s5201_s19 + $0x398] sm:$0xff] %v3748_v22 }
 0x4a0   : > { %v2678_v16 = vpop.f32.mrf.mxu2  ;;  %v2342_v1 = vpop.f32.mrf.mxu0 }
 0x4a1   : > { %v2847_v58 = vpop.f32.mrf.mxu3  ;;  %v2511_v34 = vpop.f32.mrf.mxu1 }
 0x4a2   : > { %v2848_v19 = vadd.f32 %v2847_v58, %v2678_v16  ;;  %v2512_v18 = vadd.f32 %v2511_v34, %v2342_v1 }
 0x4a4   : > { %v3750_v11 = vpack.c.bf16 %v2848_v19, %v2510_v17 }
 0x4a6   : > { %3878 = vst [vmem:[%s5201_s19 + $0x3a8] sm:$0xff] %v3750_v11 }
 0x4a8   : > { %v2680_v8 = vpop.f32.mrf.mxu2  ;;  %v2345_v48 = vpop.f32.mrf.mxu0 }
 0x4a9   : > { %v2849_v40 = vpop.f32.mrf.mxu3  ;;  %v2514_v35 = vpop.f32.mrf.mxu1 }
 0x4aa   : > { %v2850_v28 = vadd.f32 %v2849_v40, %v2680_v8  ;;  %v2515_v55 = vadd.f32 %v2514_v35, %v2345_v48 }
 0x4ac   : > { %v3752_v54 = vpack.c.bf16 %v2850_v28, %v2512_v18 }
 0x4ae   : > { %3880 = vst [vmem:[%s5201_s19 + $0x3b8] sm:$0xff] %v3752_v54 }
 0x4b0   : > { %v2683_v63 = vpop.f32.mrf.mxu2  ;;  %v2347_v13 = vpop.f32.mrf.mxu0 }
 0x4b1   : > { %v2852_v51 = vpop.f32.mrf.mxu3  ;;  %v2516_v23 = vpop.f32.mrf.mxu1 }
 0x4b2   : > { %v2853_v53 = vadd.f32 %v2852_v51, %v2683_v63  ;;  %v2517_v36 = vadd.f32 %v2516_v23, %v2347_v13 }
 0x4b4   : > { %v3754_v24 = vpack.c.bf16 %v2853_v53, %v2515_v55 }
 0x4b6   : > { %3882 = vst [vmem:[%s5201_s19 + $0x3c8] sm:$0xff] %v3754_v24 }
 0x4b8   : > { %v2685_v30 = vpop.f32.mrf.mxu2  ;;  %v2350_v6 = vpop.f32.mrf.mxu0 }
 0x4b9   : > { %v2854_v14 = vpop.f32.mrf.mxu3  ;;  %v2519_v9 = vpop.f32.mrf.mxu1 }
 0x4ba   : > { %v2855_v42 = vadd.f32 %v2854_v14, %v2685_v30  ;;  %v2520_v26 = vadd.f32 %v2519_v9, %v2350_v6 }
 0x4bc   : > { %v3756_v46 = vpack.c.bf16 %v2855_v42, %v2517_v36 }
 0x4be   : > { %3884 = vst [vmem:[%s5201_s19 + $0x3d8] sm:$0xff] %v3756_v46 }
 0x4c0   : > { %v2688_v27 = vpop.f32.mrf.mxu2  ;;  %v2352_v43 = vpop.f32.mrf.mxu0 }
 0x4c1   : > { %v2857_v15 = vpop.f32.mrf.mxu3  ;;  %v2521_v47 = vpop.f32.mrf.mxu1 }
 0x4c2   : > { %v2858_v39 = vadd.f32 %v2857_v15, %v2688_v27  ;;  %v2522_v59 = vadd.f32 %v2521_v47, %v2352_v43 }
 0x4c4   : > { %v3758_v2 = vpack.c.bf16 %v2858_v39, %v2520_v26 }
 0x4c6   : > { %3886 = vst [vmem:[%s5201_s19 + $0x3e8] sm:$0xff] %v3758_v2 }
 0x4c8   : > { %v2690_v41 = vpop.f32.mrf.mxu2 }
 0x4c9   : > { %v2859_v10 = vpop.f32.mrf.mxu3 }
 0x4ca   : > { %v2860_v3 = vadd.f32 %v2859_v10, %v2690_v41 }
 0x4cc   : > { %v3760_v62 = vpack.c.bf16 %v2860_v3, %v2522_v59 }
 0x4ce   : > { %3888 = vst [vmem:[%s5201_s19 + $0x3f8] sm:$0xff] %v3760_v62 }
 0x4cf   : > { %4842 = shalt.err (!%p4839_p0)
}
 0x4d0   : > { %s4909_s30 = smov 256   ;;  %s4910_s6 = smov 512  }
 0x4d1   : > { %s4911_s7 = smov 16  }
 0x4d2   : > { %4680 = dma.vmem_to_hbm [thread:$0]  (%p5006_p5), %s3906_s22, 16384, %s3908_s23, %s3890_s12, %s4909_s30, %s4910_s6, %s4911_s7  }
 0x4d3 PF: > { %s3922_s17 = sand.u32 1, %s4881_s9   ;;  %p4691_p3 = pnand %p4019_p11, %p4976_p6 }
 0x4d4   : > { %s3923_s19 = scalar_lea.sflag [#allocation5], %s3922_s17 }
 0x4d5   : > { %p4692_p7 = pneg %p4691_p3 }
 0x4d7   : > { %4876 = dma.done.wait (%p4692_p7), %s3923_s19, 16384  }
 0x4d8   : > { %4878 = vsyncadd (%p4692_p7), %s3923_s19, 4294950912  ;;  %s19_s14 = sadd.s32 1, %s4901_s14   ;;  %s5800_s9 = smov %s4885_s10 }
 0x4d9   : > { %p16_p9 = scmp.ge.s32.totalorder %s19_s14, 4   ;;  %s5801_s10 = smov %s4889_s11 }
 0x4da   : > { %s5802_s11 = smov %s5015_s8  ;;  %s5803_s12 = smov %s4897_s13 }
 0x4db   : > { %s5804_s13 = smov %s5806_s29  ;;  %18 = sbr.rel (!%p16_p9) target bundleno = 7 (0x7), region = 87 }
 0x4e0   :  { %3929 = vsyncpa [#allocation4], 1 }
 0x4e1   :  { %3931 = vsyncpa [#allocation4 + $0x1], 1 }
 0x4e2   :  { %3932 = vsyncpa [#allocation7], 1 }
 0x4e3   :  { %3934 = vsyncpa [#allocation7 + $0x1], 1 }
 0x4e4   :  { %3935 = vsyncpa [#allocation5], 1 }
 0x4e5   :  { %3937 = vsyncpa [#allocation5 + $0x1], 1 }

</bundles_post_ra>
